<compile_context>
chip_gen: v6e
topology: v6e:2x2x1
jax: 0.10.0
libtpu: 0.0.40
codegen_flags: <defaults>
</compile_context>

<pallas_src>
import math
import numpy as np
import jax
import jax.numpy as jnp
from jax.experimental import pallas as pl
from jax.experimental.pallas import tpu as pltpu

# ---- small, module-consistent config (module: E=1024, H=8, FF=4E) ----
E  = 128         # num_embeddings (small, lane-aligned stand-in for 1024)
H  = 8           # num_attention_heads (matches the module)
HD = E // H      # head dim = 16
FF = 4 * E       # hidden_layer_dim = 512
L  = 8           # sequence length
N  = 2           # batch
R  = N * L       # total rows processed per invocation = 16
EPS = 1e-5       # LayerNorm eps (PyTorch default)


def encoder_block_kernel(x_ref,
                         wqkv_ref, bqkv_ref, wo_ref, bo_ref,
                         g1_ref, be1_ref,
                         w1_ref, b1_ref, w2_ref, b2_ref,
                         g2_ref, be2_ref,
                         o_ref):
    x = x_ref[...]                                              # (R, E), rows batch-major

    # ---------------- fused QKV projection (single MXU push) ----------------
    qkv = jnp.dot(x, wqkv_ref[...], preferred_element_type=jnp.float32) + bqkv_ref[...]
    q = qkv[:, 0 * E:1 * E]
    k = qkv[:, 1 * E:2 * E]
    v = qkv[:, 2 * E:3 * E]

    # ---------------- head-batched self-attention ----------------
    # (R, E) -> (H*N, L, HD): per-head lane slice, leading-dim split, concat on batch axis.
    def to_heads(t):
        return jnp.concatenate(
            [t[:, h * HD:(h + 1) * HD].reshape(N, L, HD) for h in range(H)], axis=0)

    qh = to_heads(q)
    kh = to_heads(k)
    vh = to_heads(v)                                            # (H*N, L, HD)

    scale = 1.0 / math.sqrt(HD)
    s = jnp.einsum('bld,bmd->blm', qh, kh,
                   preferred_element_type=jnp.float32) * scale   # (H*N, L, L)
    s = s - jnp.max(s, axis=-1, keepdims=True)                   # one batched reduction
    p = jnp.exp(s)
    p = p / jnp.sum(p, axis=-1, keepdims=True)                   # exact divide (tolerance)
    oh = jnp.einsum('blm,bmd->bld', p, vh,
                    preferred_element_type=jnp.float32)          # (H*N, L, HD)

    # (H*N, L, HD) -> (R, E): per-head leading slice, merge leading dims, concat along lanes.
    attn = jnp.concatenate(
        [oh[h * N:(h + 1) * N].reshape(R, HD) for h in range(H)], axis=-1)
    attn = jnp.dot(attn, wo_ref[...], preferred_element_type=jnp.float32) + bo_ref[...]

    # TODO(synk): dropout layers are identity here (eval/inference semantics).

    # ---------------- residual + LayerNorm 1 ----------------
    x1 = x + attn
    mu = jnp.mean(x1, axis=-1, keepdims=True)
    var = jnp.mean((x1 - mu) ** 2, axis=-1, keepdims=True)
    x1n = (x1 - mu) * jax.lax.rsqrt(var + EPS) * g1_ref[...] + be1_ref[...]

    # ---------------- feed forward ----------------
    hid = jnp.dot(x1n, w1_ref[...], preferred_element_type=jnp.float32) + b1_ref[...]
    hid = jnp.maximum(hid, 0.0)
    ff = jnp.dot(hid, w2_ref[...], preferred_element_type=jnp.float32) + b2_ref[...]

    # ---------------- residual + LayerNorm 2 ----------------
    x2 = x1n + ff
    mu2 = jnp.mean(x2, axis=-1, keepdims=True)
    var2 = jnp.mean((x2 - mu2) ** 2, axis=-1, keepdims=True)
    o_ref[...] = ((x2 - mu2) * jax.lax.rsqrt(var2 + EPS) * g2_ref[...]
                  + be2_ref[...]).astype(o_ref.dtype)


def transformer_encoder_block(x_lne, params):
    """x_lne: (L, N, E) float32 — PyTorch (seq, batch, embed) convention."""
    x2d = jnp.transpose(x_lne, (1, 0, 2)).reshape(R, E)         # batch-major rows
    vmem = pl.BlockSpec(memory_space=pltpu.MemorySpace.VMEM)    # whole array, VMEM-resident
    out2d = pl.pallas_call(
        encoder_block_kernel,
        out_shape=jax.ShapeDtypeStruct((R, E), jnp.float32),
        in_specs=[vmem] * (1 + len(params)),
        out_specs=vmem,
    )(x2d, *params)
    return jnp.transpose(out2d.reshape(N, L, E), (1, 0, 2))     # back to (L, N, E)


def make_params(key):
    ks = jax.random.split(key, 8)
    u = lambda k, shape, b: jax.random.uniform(k, shape, jnp.float32, -b, b)
    bound_e = 1.0 / math.sqrt(E)
    # nn.MultiheadAttention: in_proj_weight (3E, E), in_proj_bias (3E,)
    in_proj_w = u(ks[0], (3 * E, E), bound_e)
    in_proj_b = u(ks[1], (3 * E,), bound_e)
    wqkv = in_proj_w.T                         # (E, 3E): x @ wqkv -> [q | k | v]
    bqkv = in_proj_b.reshape(1, 3 * E)
    wo = u(ks[2], (E, E), bound_e).T
    bo = u(ks[3], (E,), bound_e).reshape(1, E)
    # LayerNorm default init
    g1, be1 = jnp.ones((1, E), jnp.float32), jnp.zeros((1, E), jnp.float32)
    g2, be2 = jnp.ones((1, E), jnp.float32), jnp.zeros((1, E), jnp.float32)
    # FeedForward: fc1 (FF, E), fc2 (E, FF) — stored transposed for x @ W
    bound_ff = 1.0 / math.sqrt(FF)
    w1 = u(ks[4], (FF, E), bound_e).T          # (E, FF)
    b1 = u(ks[5], (FF,), bound_e).reshape(1, FF)
    w2 = u(ks[6], (E, FF), bound_ff).T         # (FF, E)
    b2 = u(ks[7], (E,), bound_ff).reshape(1, E)
    return (wqkv, bqkv, wo, bo, g1, be1, w1, b1, w2, b2, g2, be2)


def reference(x_lne, params):
    """Pure-JAX reference replicating PyTorch eval-mode forward."""
    wqkv, bqkv, wo, bo, g1, be1, w1, b1, w2, b2, g2, be2 = params
    x = jnp.transpose(x_lne, (1, 0, 2))                         # (N, L, E)
    qkv = x @ wqkv + bqkv
    q = qkv[..., 0:E].reshape(N, L, H, HD)
    k = qkv[..., E:2 * E].reshape(N, L, H, HD)
    v = qkv[..., 2 * E:].reshape(N, L, H, HD)
    s = jnp.einsum('nlhd,nmhd->nhlm', q, k) / math.sqrt(HD)
    p = jax.nn.softmax(s, axis=-1)
    a = jnp.einsum('nhlm,nmhd->nlhd', p, v).reshape(N, L, E)
    attn = a @ wo + bo
    x1 = x + attn
    ln = lambda z, g, b: (z - z.mean(-1, keepdims=True)) * jax.lax.rsqrt(
        z.var(-1, keepdims=True) + EPS) * g + b
    x1n = ln(x1, g1, be1)
    ff = jnp.maximum(x1n @ w1 + b1, 0.0) @ w2 + b2
    x2n = ln(x1n + ff, g2, be2)
    return jnp.transpose(x2n, (1, 0, 2))


if __name__ == "__main__":
    key = jax.random.PRNGKey(0)
    kx, kp = jax.random.split(key)
    x = jax.random.normal(kx, (L, N, E), jnp.float32)   # (seq, batch, embed)
    params = make_params(kp)

    run = jax.jit(transformer_encoder_block)
    out = jax.block_until_ready(run(x, params))

    ref = reference(x, params)
    np.testing.assert_allclose(np.asarray(out), np.asarray(ref), rtol=1e-4, atol=1e-4)
    print("KERNEL_OK")
</pallas_src>

<mosaic_0001>
module attributes {stable_mosaic.version = 11 : i64} {
  func.func @encoder_block_kernel(%arg0: memref<16x128xf32, #tpu.memory_space<vmem>>, %arg1: memref<128x384xf32, #tpu.memory_space<vmem>>, %arg2: memref<1x384xf32, #tpu.memory_space<vmem>>, %arg3: memref<128x128xf32, #tpu.memory_space<vmem>>, %arg4: memref<1x128xf32, #tpu.memory_space<vmem>>, %arg5: memref<1x128xf32, #tpu.memory_space<vmem>>, %arg6: memref<1x128xf32, #tpu.memory_space<vmem>>, %arg7: memref<128x512xf32, #tpu.memory_space<vmem>>, %arg8: memref<1x512xf32, #tpu.memory_space<vmem>>, %arg9: memref<512x128xf32, #tpu.memory_space<vmem>>, %arg10: memref<1x128xf32, #tpu.memory_space<vmem>>, %arg11: memref<1x128xf32, #tpu.memory_space<vmem>>, %arg12: memref<1x128xf32, #tpu.memory_space<vmem>>, %arg13: memref<16x128xf32, #tpu.memory_space<vmem>>) attributes {dimension_semantics = [], scalar_prefetch = 0 : i64, scratch_operands = 0 : i64, tpu.core_type = #tpu.core_type<tc>} {
    %c0 = arith.constant 0 : index
    %c0_0 = arith.constant 0 : index
    %0 = vector.load %arg0[%c0, %c0_0] : memref<16x128xf32, #tpu.memory_space<vmem>>, vector<16x128xf32>
    %c0_1 = arith.constant 0 : index
    %c0_2 = arith.constant 0 : index
    %1 = vector.load %arg1[%c0_1, %c0_2] : memref<128x384xf32, #tpu.memory_space<vmem>>, vector<128x384xf32>
    %cst = arith.constant dense<0.000000e+00> : vector<16x384xf32>
    %2 = tpu.matmul %0, %1, %cst {dimension_numbers = #tpu.dot_dimension_numbers<[1], [0], [0], [1], [0, 0, 1, 1], [], []>} : vector<16x128xf32>, vector<128x384xf32>, vector<16x384xf32> -> vector<16x384xf32>
    %c0_3 = arith.constant 0 : index
    %c0_4 = arith.constant 0 : index
    %3 = vector.load %arg2[%c0_3, %c0_4] : memref<1x384xf32, #tpu.memory_space<vmem>>, vector<1x384xf32>
    %4 = vector.broadcast %3 : vector<1x384xf32> to vector<16x384xf32>
    %5 = arith.addf %2, %4 : vector<16x384xf32>
    %6 = vector.extract_strided_slice %5 {offsets = [0, 0], sizes = [16, 128], strides = [1, 1]} : vector<16x384xf32> to vector<16x128xf32>
    %7 = vector.extract_strided_slice %5 {offsets = [0, 128], sizes = [16, 128], strides = [1, 1]} : vector<16x384xf32> to vector<16x128xf32>
    %8 = vector.extract_strided_slice %5 {offsets = [0, 256], sizes = [16, 128], strides = [1, 1]} : vector<16x384xf32> to vector<16x128xf32>
    %9 = vector.extract_strided_slice %6 {offsets = [0, 0], sizes = [16, 16], strides = [1, 1]} : vector<16x128xf32> to vector<16x16xf32>
    %10 = vector.shape_cast %9 : vector<16x16xf32> to vector<2x8x16xf32>
    %11 = vector.extract_strided_slice %6 {offsets = [0, 16], sizes = [16, 16], strides = [1, 1]} : vector<16x128xf32> to vector<16x16xf32>
    %12 = vector.shape_cast %11 : vector<16x16xf32> to vector<2x8x16xf32>
    %13 = vector.extract_strided_slice %6 {offsets = [0, 32], sizes = [16, 16], strides = [1, 1]} : vector<16x128xf32> to vector<16x16xf32>
    %14 = vector.shape_cast %13 : vector<16x16xf32> to vector<2x8x16xf32>
    %15 = vector.extract_strided_slice %6 {offsets = [0, 48], sizes = [16, 16], strides = [1, 1]} : vector<16x128xf32> to vector<16x16xf32>
    %16 = vector.shape_cast %15 : vector<16x16xf32> to vector<2x8x16xf32>
    %17 = vector.extract_strided_slice %6 {offsets = [0, 64], sizes = [16, 16], strides = [1, 1]} : vector<16x128xf32> to vector<16x16xf32>
    %18 = vector.shape_cast %17 : vector<16x16xf32> to vector<2x8x16xf32>
    %19 = vector.extract_strided_slice %6 {offsets = [0, 80], sizes = [16, 16], strides = [1, 1]} : vector<16x128xf32> to vector<16x16xf32>
    %20 = vector.shape_cast %19 : vector<16x16xf32> to vector<2x8x16xf32>
    %21 = vector.extract_strided_slice %6 {offsets = [0, 96], sizes = [16, 16], strides = [1, 1]} : vector<16x128xf32> to vector<16x16xf32>
    %22 = vector.shape_cast %21 : vector<16x16xf32> to vector<2x8x16xf32>
    %23 = vector.extract_strided_slice %6 {offsets = [0, 112], sizes = [16, 16], strides = [1, 1]} : vector<16x128xf32> to vector<16x16xf32>
    %24 = vector.shape_cast %23 : vector<16x16xf32> to vector<2x8x16xf32>
    %25 = tpu.concatenate %10, %12, %14, %16, %18, %20, %22, %24 in 0 : vector<2x8x16xf32>, vector<2x8x16xf32>, vector<2x8x16xf32>, vector<2x8x16xf32>, vector<2x8x16xf32>, vector<2x8x16xf32>, vector<2x8x16xf32>, vector<2x8x16xf32> -> vector<16x8x16xf32>
    %26 = vector.extract_strided_slice %7 {offsets = [0, 0], sizes = [16, 16], strides = [1, 1]} : vector<16x128xf32> to vector<16x16xf32>
    %27 = vector.shape_cast %26 : vector<16x16xf32> to vector<2x8x16xf32>
    %28 = vector.extract_strided_slice %7 {offsets = [0, 16], sizes = [16, 16], strides = [1, 1]} : vector<16x128xf32> to vector<16x16xf32>
    %29 = vector.shape_cast %28 : vector<16x16xf32> to vector<2x8x16xf32>
    %30 = vector.extract_strided_slice %7 {offsets = [0, 32], sizes = [16, 16], strides = [1, 1]} : vector<16x128xf32> to vector<16x16xf32>
    %31 = vector.shape_cast %30 : vector<16x16xf32> to vector<2x8x16xf32>
    %32 = vector.extract_strided_slice %7 {offsets = [0, 48], sizes = [16, 16], strides = [1, 1]} : vector<16x128xf32> to vector<16x16xf32>
    %33 = vector.shape_cast %32 : vector<16x16xf32> to vector<2x8x16xf32>
    %34 = vector.extract_strided_slice %7 {offsets = [0, 64], sizes = [16, 16], strides = [1, 1]} : vector<16x128xf32> to vector<16x16xf32>
    %35 = vector.shape_cast %34 : vector<16x16xf32> to vector<2x8x16xf32>
    %36 = vector.extract_strided_slice %7 {offsets = [0, 80], sizes = [16, 16], strides = [1, 1]} : vector<16x128xf32> to vector<16x16xf32>
    %37 = vector.shape_cast %36 : vector<16x16xf32> to vector<2x8x16xf32>
    %38 = vector.extract_strided_slice %7 {offsets = [0, 96], sizes = [16, 16], strides = [1, 1]} : vector<16x128xf32> to vector<16x16xf32>
    %39 = vector.shape_cast %38 : vector<16x16xf32> to vector<2x8x16xf32>
    %40 = vector.extract_strided_slice %7 {offsets = [0, 112], sizes = [16, 16], strides = [1, 1]} : vector<16x128xf32> to vector<16x16xf32>
    %41 = vector.shape_cast %40 : vector<16x16xf32> to vector<2x8x16xf32>
    %42 = tpu.concatenate %27, %29, %31, %33, %35, %37, %39, %41 in 0 : vector<2x8x16xf32>, vector<2x8x16xf32>, vector<2x8x16xf32>, vector<2x8x16xf32>, vector<2x8x16xf32>, vector<2x8x16xf32>, vector<2x8x16xf32>, vector<2x8x16xf32> -> vector<16x8x16xf32>
    %43 = vector.extract_strided_slice %8 {offsets = [0, 0], sizes = [16, 16], strides = [1, 1]} : vector<16x128xf32> to vector<16x16xf32>
    %44 = vector.shape_cast %43 : vector<16x16xf32> to vector<2x8x16xf32>
    %45 = vector.extract_strided_slice %8 {offsets = [0, 16], sizes = [16, 16], strides = [1, 1]} : vector<16x128xf32> to vector<16x16xf32>
    %46 = vector.shape_cast %45 : vector<16x16xf32> to vector<2x8x16xf32>
    %47 = vector.extract_strided_slice %8 {offsets = [0, 32], sizes = [16, 16], strides = [1, 1]} : vector<16x128xf32> to vector<16x16xf32>
    %48 = vector.shape_cast %47 : vector<16x16xf32> to vector<2x8x16xf32>
    %49 = vector.extract_strided_slice %8 {offsets = [0, 48], sizes = [16, 16], strides = [1, 1]} : vector<16x128xf32> to vector<16x16xf32>
    %50 = vector.shape_cast %49 : vector<16x16xf32> to vector<2x8x16xf32>
    %51 = vector.extract_strided_slice %8 {offsets = [0, 64], sizes = [16, 16], strides = [1, 1]} : vector<16x128xf32> to vector<16x16xf32>
    %52 = vector.shape_cast %51 : vector<16x16xf32> to vector<2x8x16xf32>
    %53 = vector.extract_strided_slice %8 {offsets = [0, 80], sizes = [16, 16], strides = [1, 1]} : vector<16x128xf32> to vector<16x16xf32>
    %54 = vector.shape_cast %53 : vector<16x16xf32> to vector<2x8x16xf32>
    %55 = vector.extract_strided_slice %8 {offsets = [0, 96], sizes = [16, 16], strides = [1, 1]} : vector<16x128xf32> to vector<16x16xf32>
    %56 = vector.shape_cast %55 : vector<16x16xf32> to vector<2x8x16xf32>
    %57 = vector.extract_strided_slice %8 {offsets = [0, 112], sizes = [16, 16], strides = [1, 1]} : vector<16x128xf32> to vector<16x16xf32>
    %58 = vector.shape_cast %57 : vector<16x16xf32> to vector<2x8x16xf32>
    %59 = tpu.concatenate %44, %46, %48, %50, %52, %54, %56, %58 in 0 : vector<2x8x16xf32>, vector<2x8x16xf32>, vector<2x8x16xf32>, vector<2x8x16xf32>, vector<2x8x16xf32>, vector<2x8x16xf32>, vector<2x8x16xf32>, vector<2x8x16xf32> -> vector<16x8x16xf32>
    "tpu.trace_start"() <{level = 10 : i32, message = "bld,bmd->blm"}> : () -> ()
    %cst_5 = arith.constant dense<0.000000e+00> : vector<16x8x8xf32>
    %60 = tpu.matmul %25, %42, %cst_5 {dimension_numbers = #tpu.dot_dimension_numbers<[2], [2], [1], [1], [0, 0, 0, 1, 1, 1], [0], [0]>} : vector<16x8x16xf32>, vector<16x8x16xf32>, vector<16x8x8xf32> -> vector<16x8x8xf32>
    "tpu.trace_stop"() : () -> ()
    %cst_6 = arith.constant 2.500000e-01 : f32
    %61 = vector.broadcast %cst_6 : f32 to vector<16x8x8xf32>
    %62 = arith.mulf %60, %61 : vector<16x8x8xf32>
    %cst_7 = arith.constant dense<0xFF800000> : vector<16x8xf32>
    %63 = vector.multi_reduction <maximumf>, %62, %cst_7 [2] : vector<16x8x8xf32> to vector<16x8xf32>
    %64 = vector.shape_cast %63 : vector<16x8xf32> to vector<16x8x1xf32>
    %65 = vector.broadcast %64 : vector<16x8x1xf32> to vector<16x8x8xf32>
    %66 = arith.subf %62, %65 : vector<16x8x8xf32>
    %67 = math.exp %66 : vector<16x8x8xf32>
    %cst_8 = arith.constant dense<0.000000e+00> : vector<16x8xf32>
    %68 = vector.multi_reduction <add>, %67, %cst_8 [2] : vector<16x8x8xf32> to vector<16x8xf32>
    %69 = vector.shape_cast %68 : vector<16x8xf32> to vector<16x8x1xf32>
    %70 = vector.broadcast %69 : vector<16x8x1xf32> to vector<16x8x8xf32>
    %71 = arith.divf %67, %70 : vector<16x8x8xf32>
    "tpu.trace_start"() <{level = 10 : i32, message = "blm,bmd->bld"}> : () -> ()
    %cst_9 = arith.constant dense<0.000000e+00> : vector<16x8x16xf32>
    %72 = tpu.matmul %71, %59, %cst_9 {dimension_numbers = #tpu.dot_dimension_numbers<[2], [1], [1], [2], [0, 0, 0, 1, 1, 2], [0], [0]>} : vector<16x8x8xf32>, vector<16x8x16xf32>, vector<16x8x16xf32> -> vector<16x8x16xf32>
    "tpu.trace_stop"() : () -> ()
    %73 = vector.extract_strided_slice %72 {offsets = [0, 0, 0], sizes = [2, 8, 16], strides = [1, 1, 1]} : vector<16x8x16xf32> to vector<2x8x16xf32>
    %74 = vector.shape_cast %73 : vector<2x8x16xf32> to vector<16x16xf32>
    %75 = vector.extract_strided_slice %72 {offsets = [2, 0, 0], sizes = [2, 8, 16], strides = [1, 1, 1]} : vector<16x8x16xf32> to vector<2x8x16xf32>
    %76 = vector.shape_cast %75 : vector<2x8x16xf32> to vector<16x16xf32>
    %77 = vector.extract_strided_slice %72 {offsets = [4, 0, 0], sizes = [2, 8, 16], strides = [1, 1, 1]} : vector<16x8x16xf32> to vector<2x8x16xf32>
    %78 = vector.shape_cast %77 : vector<2x8x16xf32> to vector<16x16xf32>
    %79 = vector.extract_strided_slice %72 {offsets = [6, 0, 0], sizes = [2, 8, 16], strides = [1, 1, 1]} : vector<16x8x16xf32> to vector<2x8x16xf32>
    %80 = vector.shape_cast %79 : vector<2x8x16xf32> to vector<16x16xf32>
    %81 = vector.extract_strided_slice %72 {offsets = [8, 0, 0], sizes = [2, 8, 16], strides = [1, 1, 1]} : vector<16x8x16xf32> to vector<2x8x16xf32>
    %82 = vector.shape_cast %81 : vector<2x8x16xf32> to vector<16x16xf32>
    %83 = vector.extract_strided_slice %72 {offsets = [10, 0, 0], sizes = [2, 8, 16], strides = [1, 1, 1]} : vector<16x8x16xf32> to vector<2x8x16xf32>
    %84 = vector.shape_cast %83 : vector<2x8x16xf32> to vector<16x16xf32>
    %85 = vector.extract_strided_slice %72 {offsets = [12, 0, 0], sizes = [2, 8, 16], strides = [1, 1, 1]} : vector<16x8x16xf32> to vector<2x8x16xf32>
    %86 = vector.shape_cast %85 : vector<2x8x16xf32> to vector<16x16xf32>
    %87 = vector.extract_strided_slice %72 {offsets = [14, 0, 0], sizes = [2, 8, 16], strides = [1, 1, 1]} : vector<16x8x16xf32> to vector<2x8x16xf32>
    %88 = vector.shape_cast %87 : vector<2x8x16xf32> to vector<16x16xf32>
    %89 = tpu.concatenate %74, %76, %78, %80, %82, %84, %86, %88 in 1 : vector<16x16xf32>, vector<16x16xf32>, vector<16x16xf32>, vector<16x16xf32>, vector<16x16xf32>, vector<16x16xf32>, vector<16x16xf32>, vector<16x16xf32> -> vector<16x128xf32>
    %c0_10 = arith.constant 0 : index
    %c0_11 = arith.constant 0 : index
    %90 = vector.load %arg3[%c0_10, %c0_11] : memref<128x128xf32, #tpu.memory_space<vmem>>, vector<128x128xf32>
    %cst_12 = arith.constant dense<0.000000e+00> : vector<16x128xf32>
    %91 = tpu.matmul %89, %90, %cst_12 {dimension_numbers = #tpu.dot_dimension_numbers<[1], [0], [0], [1], [0, 0, 1, 1], [], []>} : vector<16x128xf32>, vector<128x128xf32>, vector<16x128xf32> -> vector<16x128xf32>
    %c0_13 = arith.constant 0 : index
    %c0_14 = arith.constant 0 : index
    %92 = vector.load %arg4[%c0_13, %c0_14] : memref<1x128xf32, #tpu.memory_space<vmem>>, vector<1x128xf32>
    %93 = vector.broadcast %92 : vector<1x128xf32> to vector<16x128xf32>
    %94 = arith.addf %91, %93 : vector<16x128xf32>
    %95 = arith.addf %0, %94 : vector<16x128xf32>
    %cst_15 = arith.constant dense<0.000000e+00> : vector<16xf32>
    %96 = vector.multi_reduction <add>, %95, %cst_15 [1] : vector<16x128xf32> to vector<16xf32>
    %97 = vector.shape_cast %96 : vector<16xf32> to vector<16x1xf32>
    %cst_16 = arith.constant 1.280000e+02 : f32
    %98 = vector.broadcast %cst_16 : f32 to vector<16x1xf32>
    %99 = arith.divf %97, %98 : vector<16x1xf32>
    %100 = vector.broadcast %99 : vector<16x1xf32> to vector<16x128xf32>
    %101 = arith.subf %95, %100 : vector<16x128xf32>
    %102 = arith.mulf %101, %101 : vector<16x128xf32>
    %cst_17 = arith.constant dense<0.000000e+00> : vector<16xf32>
    %103 = vector.multi_reduction <add>, %102, %cst_17 [1] : vector<16x128xf32> to vector<16xf32>
    %104 = vector.shape_cast %103 : vector<16xf32> to vector<16x1xf32>
    %cst_18 = arith.constant 1.280000e+02 : f32
    %105 = vector.broadcast %cst_18 : f32 to vector<16x1xf32>
    %106 = arith.divf %104, %105 : vector<16x1xf32>
    %107 = vector.broadcast %99 : vector<16x1xf32> to vector<16x128xf32>
    %108 = arith.subf %95, %107 : vector<16x128xf32>
    %cst_19 = arith.constant 9.99999974E-6 : f32
    %109 = vector.broadcast %cst_19 : f32 to vector<16x1xf32>
    %110 = arith.addf %106, %109 : vector<16x1xf32>
    %111 = math.rsqrt %110 : vector<16x1xf32>
    %112 = vector.broadcast %111 : vector<16x1xf32> to vector<16x128xf32>
    %113 = arith.mulf %108, %112 : vector<16x128xf32>
    %c0_20 = arith.constant 0 : index
    %c0_21 = arith.constant 0 : index
    %114 = vector.load %arg5[%c0_20, %c0_21] : memref<1x128xf32, #tpu.memory_space<vmem>>, vector<1x128xf32>
    %115 = vector.broadcast %114 : vector<1x128xf32> to vector<16x128xf32>
    %116 = arith.mulf %113, %115 : vector<16x128xf32>
    %c0_22 = arith.constant 0 : index
    %c0_23 = arith.constant 0 : index
    %117 = vector.load %arg6[%c0_22, %c0_23] : memref<1x128xf32, #tpu.memory_space<vmem>>, vector<1x128xf32>
    %118 = vector.broadcast %117 : vector<1x128xf32> to vector<16x128xf32>
    %119 = arith.addf %116, %118 : vector<16x128xf32>
    %c0_24 = arith.constant 0 : index
    %c0_25 = arith.constant 0 : index
    %120 = vector.load %arg7[%c0_24, %c0_25] : memref<128x512xf32, #tpu.memory_space<vmem>>, vector<128x512xf32>
    %cst_26 = arith.constant dense<0.000000e+00> : vector<16x512xf32>
    %121 = tpu.matmul %119, %120, %cst_26 {dimension_numbers = #tpu.dot_dimension_numbers<[1], [0], [0], [1], [0, 0, 1, 1], [], []>} : vector<16x128xf32>, vector<128x512xf32>, vector<16x512xf32> -> vector<16x512xf32>
    %c0_27 = arith.constant 0 : index
    %c0_28 = arith.constant 0 : index
    %122 = vector.load %arg8[%c0_27, %c0_28] : memref<1x512xf32, #tpu.memory_space<vmem>>, vector<1x512xf32>
    %123 = vector.broadcast %122 : vector<1x512xf32> to vector<16x512xf32>
    %124 = arith.addf %121, %123 : vector<16x512xf32>
    %cst_29 = arith.constant 0.000000e+00 : f32
    %125 = vector.broadcast %cst_29 : f32 to vector<16x512xf32>
    %126 = arith.maximumf %124, %125 : vector<16x512xf32>
    %c0_30 = arith.constant 0 : index
    %c0_31 = arith.constant 0 : index
    %127 = vector.load %arg9[%c0_30, %c0_31] : memref<512x128xf32, #tpu.memory_space<vmem>>, vector<512x128xf32>
    %cst_32 = arith.constant dense<0.000000e+00> : vector<16x128xf32>
    %128 = tpu.matmul %126, %127, %cst_32 {dimension_numbers = #tpu.dot_dimension_numbers<[1], [0], [0], [1], [0, 0, 1, 1], [], []>} : vector<16x512xf32>, vector<512x128xf32>, vector<16x128xf32> -> vector<16x128xf32>
    %c0_33 = arith.constant 0 : index
    %c0_34 = arith.constant 0 : index
    %129 = vector.load %arg10[%c0_33, %c0_34] : memref<1x128xf32, #tpu.memory_space<vmem>>, vector<1x128xf32>
    %130 = vector.broadcast %129 : vector<1x128xf32> to vector<16x128xf32>
    %131 = arith.addf %128, %130 : vector<16x128xf32>
    %132 = arith.addf %119, %131 : vector<16x128xf32>
    %cst_35 = arith.constant dense<0.000000e+00> : vector<16xf32>
    %133 = vector.multi_reduction <add>, %132, %cst_35 [1] : vector<16x128xf32> to vector<16xf32>
    %134 = vector.shape_cast %133 : vector<16xf32> to vector<16x1xf32>
    %cst_36 = arith.constant 1.280000e+02 : f32
    %135 = vector.broadcast %cst_36 : f32 to vector<16x1xf32>
    %136 = arith.divf %134, %135 : vector<16x1xf32>
    %137 = vector.broadcast %136 : vector<16x1xf32> to vector<16x128xf32>
    %138 = arith.subf %132, %137 : vector<16x128xf32>
    %139 = arith.mulf %138, %138 : vector<16x128xf32>
    %cst_37 = arith.constant dense<0.000000e+00> : vector<16xf32>
    %140 = vector.multi_reduction <add>, %139, %cst_37 [1] : vector<16x128xf32> to vector<16xf32>
    %141 = vector.shape_cast %140 : vector<16xf32> to vector<16x1xf32>
    %cst_38 = arith.constant 1.280000e+02 : f32
    %142 = vector.broadcast %cst_38 : f32 to vector<16x1xf32>
    %143 = arith.divf %141, %142 : vector<16x1xf32>
    %144 = vector.broadcast %136 : vector<16x1xf32> to vector<16x128xf32>
    %145 = arith.subf %132, %144 : vector<16x128xf32>
    %cst_39 = arith.constant 9.99999974E-6 : f32
    %146 = vector.broadcast %cst_39 : f32 to vector<16x1xf32>
    %147 = arith.addf %143, %146 : vector<16x1xf32>
    %148 = math.rsqrt %147 : vector<16x1xf32>
    %149 = vector.broadcast %148 : vector<16x1xf32> to vector<16x128xf32>
    %150 = arith.mulf %145, %149 : vector<16x128xf32>
    %c0_40 = arith.constant 0 : index
    %c0_41 = arith.constant 0 : index
    %151 = vector.load %arg11[%c0_40, %c0_41] : memref<1x128xf32, #tpu.memory_space<vmem>>, vector<1x128xf32>
    %152 = vector.broadcast %151 : vector<1x128xf32> to vector<16x128xf32>
    %153 = arith.mulf %150, %152 : vector<16x128xf32>
    %c0_42 = arith.constant 0 : index
    %c0_43 = arith.constant 0 : index
    %154 = vector.load %arg12[%c0_42, %c0_43] : memref<1x128xf32, #tpu.memory_space<vmem>>, vector<1x128xf32>
    %155 = vector.broadcast %154 : vector<1x128xf32> to vector<16x128xf32>
    %156 = arith.addf %153, %155 : vector<16x128xf32>
    %c0_44 = arith.constant 0 : index
    %c0_45 = arith.constant 0 : index
    %157 = vector.load %arg13[%c0_44, %c0_45] : memref<16x128xf32, #tpu.memory_space<vmem>>, vector<16x128xf32>
    tpu.vector_store %arg13[%c0_44, %c0_45], %156 {strides = array<i32>} : memref<16x128xf32, #tpu.memory_space<vmem>>, vector<16x128xf32>,
    return
  }
}

</mosaic_0001>

<bundles_post_ra>
// kernel: transformer_encoder_block.1
= control target key start
LH: loop header
LB: loop body
LE: loop exit
PB: predicated region body
PF: predicated region fallthrough
CT: control target
= control target key end

     0   :  { %18 = vsyncpa [#allocation3], 0  ;;  %s4998_s0 = inlined_call_operand.vmem [shape: f32[16,128], index: 0, kind: input, shape index: {}]   ;;  %s4999_s1 = inlined_call_operand.hbm [shape: f32[128,384], index: 1, kind: input, shape index: {}]   ;;  %s5000_s2 = inlined_call_operand.vmem [shape: f32[1,384], index: 2, kind: input, shape index: {}]   ;;  %s5001_s3 = inlined_call_operand.hbm [shape: f32[128,128], index: 3, kind: input, shape index: {}]   ;;  %s5002_s4 = inlined_call_operand.vmem [shape: f32[1,128], index: 4, kind: input, shape index: {}]   ;;  %s5003_s5 = inlined_call_operand.vmem [shape: f32[1,128], index: 5, kind: input, shape index: {}]   ;;  %s5004_s6 = inlined_call_operand.vmem [shape: f32[1,128], index: 6, kind: input, shape index: {}]   ;;  %s5005_s7 = inlined_call_operand.hbm [shape: f32[128,512], index: 7, kind: input, shape index: {}]   ;;  %s5006_s8 = inlined_call_operand.vmem [shape: f32[1,512], index: 8, kind: input, shape index: {}]   ;;  %s5007_s9 = inlined_call_operand.hbm [shape: f32[512,128], index: 9, kind: input, shape index: {}]   ;;  %s5008_s10 = inlined_call_operand.vmem [shape: f32[1,128], index: 10, kind: input, shape index: {}]   ;;  %s5009_s11 = inlined_call_operand.vmem [shape: f32[1,128], index: 11, kind: input, shape index: {}]   ;;  %s5010_s12 = inlined_call_operand.vmem [shape: f32[1,128], index: 12, kind: input, shape index: {}]   ;;  %s5011_s13 = inlined_call_operand.vmem [shape: f32[16,128], index: 13, kind: output, shape index: {}]  }
   0x1   :  { %19 = vsyncpa [#allocation5], 0 }
   0x2   :  { %20 = vsyncpa [#allocation8], 0  ;;  %s4378_s25 = smov [#allocation4]  }
   0x3   :  { %s42_s26 = sshll.u32 %s4378_s25, 4  ;;  %s43_s26 = int_to_ptr.vmem [resolvable:$true] %s42_s26 }
   0x4   :  { %s4300_s27 = scalar_lea.vmem %s43_s26, 2048  ;;  %p4305_p1 = scmp.lt.s32.totalorder %s43_s26, %s43_s26 }
   0x5   :  { %p4301_p0 = scmp.ne.s32.totalorder %s43_s26, %s4300_s27  ;;  %p4306_p2 = scmp.lt.s32.totalorder %s4300_s27, %s4300_s27 }
   0x7   :  { %p4307_p3 = por %p4306_p2, %p4305_p1 }
   0x9   :  { %p4308_p4 = pnand %p4307_p3, %p4301_p0 }
   0xb   :  { %4311 = shalt.err (!%p4308_p4)
}
   0xc   :  { %s4379_s28 = smov 128   ;;  %s4380_s29 = smov 8  }
   0xd   :  { %48 = dma.hbm_to_vmem [thread:$0]  %s5001_s3, 2048, %s43_s26, [#allocation5], %s4379_s28, %s4379_s28, %s4380_s29  }
   0xe   :  { %s4381_s15 = smov [#allocation2]  }
   0xf   :  { %s28_s16 = sshll.u32 %s4381_s15, 4  ;;  %s29_s16 = int_to_ptr.vmem [resolvable:$true] %s28_s16 }
  0x10   :  { %s4320_s17 = scalar_lea.vmem %s29_s16, 6144  ;;  %p4325_p6 = scmp.lt.s32.totalorder %s29_s16, %s29_s16 }
  0x11   :  { %p4321_p5 = scmp.ne.s32.totalorder %s29_s16, %s4320_s17  ;;  %p4326_p7 = scmp.lt.s32.totalorder %s4320_s17, %s4320_s17 }
  0x13   :  { %p4327_p8 = por %p4326_p7, %p4325_p6 }
  0x15   :  { %p4328_p9 = pnand %p4327_p8, %p4321_p5 }
  0x17   :  { %4331 = shalt.err (!%p4328_p9)
}
  0x18   :  { %s4382_s18 = smov 384   ;;  %s4383_s19 = smov 24  }
  0x19   :  { %34 = dma.hbm_to_vmem [thread:$0]  %s4999_s1, 6144, %s29_s16, [#allocation3], %s4382_s18, %s4382_s18, %s4383_s19  }
  0x1a   :  { %s4384_s22 = smov [#allocation6]  }
  0x1b   :  { %s60_s23 = sshll.u32 %s4384_s22, 4  ;;  %s61_s23 = int_to_ptr.vmem [resolvable:$true] %s60_s23 }
  0x1c   :  { %s4340_s3 = scalar_lea.vmem %s61_s23, 8192  ;;  %p4345_p11 = scmp.lt.s32.totalorder %s61_s23, %s61_s23 }
  0x1d   :  { %p4341_p10 = scmp.ne.s32.totalorder %s61_s23, %s4340_s3  ;;  %p4346_p12 = scmp.lt.s32.totalorder %s4340_s3, %s4340_s3 }
  0x1f   :  { %p4347_p13 = por %p4346_p12, %p4345_p11 }
  0x21   :  { %p4348_p0 = pnand %p4347_p13, %p4341_p10 }
  0x23   :  { %4351 = shalt.err (!%p4348_p0)
}
  0x24   :  { %s4385_s24 = smov 512   ;;  %s4386_s25 = smov 32  }
  0x25   :  { %66 = dma.hbm_to_vmem [thread:$0]  %s5005_s7, 8192, %s61_s23, [#allocation5], %s4385_s24, %s4385_s24, %s4386_s25  }
  0x26   :  { %s4387_s30 = smov [#allocation7]  }
  0x27   :  { %s74_s14 = sshll.u32 %s4387_s30, 4  ;;  %s75_s14 = int_to_ptr.vmem [resolvable:$true] %s74_s14 }
  0x28   :  { %s4360_s1 = scalar_lea.vmem %s75_s14, 8192  ;;  %p4365_p2 = scmp.lt.s32.totalorder %s75_s14, %s75_s14 }
  0x29   :  { %p4361_p1 = scmp.ne.s32.totalorder %s75_s14, %s4360_s1  ;;  %p4366_p3 = scmp.lt.s32.totalorder %s4360_s1, %s4360_s1 }
  0x2b   :  { %p4367_p4 = por %p4366_p3, %p4365_p2 }
  0x2d   :  { %p4368_p5 = pnand %p4367_p4, %p4361_p1 }
  0x2f   :  { %4371 = shalt.err (!%p4368_p5)
}
  0x30   :  { %80 = dma.hbm_to_vmem [thread:$0]  %s5007_s9, 8192, %s75_s14, [#allocation8], %s4379_s28, %s4379_s28, %s4380_s29  }
  0x31   :  { %4372 = dma.done.wait [#allocation3], 6144  }
  0x32   :  { %4373 = vsyncadd [#allocation3], 4294961152 }
  0x33   :  { %4374 = dma.done.wait [#allocation5], 10240  }
  0x34   :  { %4375 = vsyncadd [#allocation5], 4294957056 }
  0x35   :  { %4376 = dma.done.wait [#allocation8], 8192  }
  0x36   :  { %4377 = vsyncadd [#allocation8], 4294959104  ;;  %v4388_v0 = vmov 0.0   ;;  %v147_v1 = vld [vmem:[#allocation2 + $0x170] sm:$0xff]  ;;  %v146_v2 = vld [vmem:[#allocation2 + $0x168] sm:$0xff]  ;;  %vm4389_vm0 = vmmov 0   ;;  %v151_v51 = vlaneseq }
  0x37   :  { %230 = vmatprep.mubr.f32.mxu0 %v4388_v0  ;;  %v144_v3 = vld [vmem:[#allocation2 + $0x158] sm:$0xff]  ;;  %166 = vmatprep.subr.mxu0 %v147_v1  ;;  %v143_v4 = vld [vmem:[#allocation2 + $0x150] sm:$0xff]  ;;  %v141_v5 = vld [vmem:[#allocation2 + $0x140] sm:$0xff]  ;;  %vm422_vm1 = vcmask 130048   ;;  %s4390_s19 = smov 96   ;;  %s4391_s20 = smov 112  }
  0x38   :  { %167 = vmatpush1.msra.mxu0 %v146_v2  ;;  %v140_v6 = vld [vmem:[#allocation2 + $0x138] sm:$0xff]  ;;  %v138_v7 = vld [vmem:[#allocation2 + $0x128] sm:$0xff]  ;;  %v137_v8 = vld [vmem:[#allocation2 + $0x120] sm:$0xff]  ;;  %v4503_v52 = vshrl.u32 %v151_v51, 7  ;;  %s4393_s21 = smov 64   ;;  %s4394_s22 = smov 48  }
  0x39   :  { %168 = vmatprep.subr.mxu0 %v144_v3  ;;  %v135_v9 = vld [vmem:[#allocation2 + $0x110] sm:$0xff]  ;;  %v134_v10 = vld [vmem:[#allocation2 + $0x108] sm:$0xff]  ;;  %v132_v11 = vld [vmem:[#allocation2 + $0xf8] sm:$0xff]  ;;  %s4395_s23 = smov 16   ;;  %vm1623_vm2 = vcmask 64512   ;;  %vm3026_vm3 = vcmask 261120  }
  0x3a   :  { %169 = vmatpush1.msra.mxu0 %v143_v4  ;;  %v131_v12 = vld [vmem:[#allocation2 + $0xf0] sm:$0xff]  ;;  %v129_v13 = vld [vmem:[#allocation2 + $0xe0] sm:$0xff]  ;;  %v128_v15 = vld [vmem:[#allocation2 + $0xd8] sm:$0xff]  ;;  %v153_v53 = vsub.s32 0, %v4503_v52  ;;  %v157_v55 = vsub.s32 1, %v4503_v52  ;;  %v161_v3 = vsub.s32 2, %v4503_v52 }
  0x3b   :  { %170 = vmatprep.subr.mxu0 %v141_v5  ;;  %v4489_v14 = vld [vmem:[%s4998_s0] sm:$0xff]  ;;  %v148_v16 = vld [vmem:[#allocation2 + $0x178] sm:$0xff]  ;;  %v126_v18 = vld [vmem:[#allocation2 + $0xc8] sm:$0xff]  ;;  %vm3029_vm4 = vcmask 392192   ;;  %vm3032_vm5 = vcmask 523264   ;;  %vm3035_vm6 = vcmask 654336  }
  0x3c   :  { %171 = vmatpush1.msra.mxu0 %v140_v6  ;;  %v145_v17 = vld [vmem:[#allocation2 + $0x160] sm:$0xff]  ;;  %3967 = vmatprep.mubr.f32.mxu1 %v4489_v14  ;;  %v142_v20 = vld [vmem:[#allocation2 + $0x148] sm:$0xff]  ;;  %v123_v21 = vld [vmem:[#allocation2 + $0xb0] sm:$0xff]  ;;  %vm3038_vm7 = vcmask 785408   ;;  %vm3041_vm8 = vcmask 916480  }
  0x3d   :  { %172 = vmatprep.subr.mxu0 %v138_v7  ;;  %3935 = vmatprep.subr.mxu1 %v148_v16  ;;  %v125_v19 = vld [vmem:[#allocation2 + $0xc0] sm:$0xff]  ;;  %v122_v22 = vld [vmem:[#allocation2 + $0xa8] sm:$0xff]  ;;  %v139_v23 = vld [vmem:[#allocation2 + $0x130] sm:$0xff] }
  0x3e   :  { %173 = vmatpush1.msra.mxu0 %v137_v8  ;;  %3936 = vmatpush3.msra.mxu1 %v148_v16  ;;  %v120_v24 = vld [vmem:[#allocation2 + $0x98] sm:$0xff]  ;;  %v119_v25 = vld [vmem:[#allocation2 + $0x90] sm:$0xff]  ;;  %v117_v27 = vld [vmem:[#allocation2 + $0x80] sm:$0xff] }
  0x3f   :  { %174 = vmatprep.subr.mxu0 %v135_v9  ;;  %3937 = vmatprep.subr.mxu1 %v145_v17  ;;  %v136_v26 = vld [vmem:[#allocation2 + $0x118] sm:$0xff]  ;;  %v133_v29 = vld [vmem:[#allocation2 + $0x100] sm:$0xff]  ;;  %v114_v30 = vld [vmem:[#allocation2 + $0x68] sm:$0xff] }
  0x40   :  { %175 = vmatpush1.msra.mxu0 %v134_v10  ;;  %3938 = vmatpush3.msra.mxu1 %v145_v17  ;;  %v116_v28 = vld [vmem:[#allocation2 + $0x78] sm:$0xff]  ;;  %v113_v31 = vld [vmem:[#allocation2 + $0x60] sm:$0xff]  ;;  %v130_v32 = vld [vmem:[#allocation2 + $0xe8] sm:$0xff] }
  0x41   :  { %176 = vmatprep.subr.mxu0 %v132_v11  ;;  %3939 = vmatprep.subr.mxu1 %v142_v20  ;;  %v111_v33 = vld [vmem:[#allocation2 + $0x50] sm:$0xff]  ;;  %v110_v34 = vld [vmem:[#allocation2 + $0x48] sm:$0xff]  ;;  %v108_v36 = vld [vmem:[#allocation2 + $0x38] sm:$0xff] }
  0x42   :  { %177 = vmatpush1.msra.mxu0 %v131_v12  ;;  %3940 = vmatpush3.msra.mxu1 %v142_v20  ;;  %v127_v35 = vld [vmem:[#allocation2 + $0xd0] sm:$0xff]  ;;  %v124_v38 = vld [vmem:[#allocation2 + $0xb8] sm:$0xff]  ;;  %v105_v39 = vld [vmem:[#allocation2 + $0x20] sm:$0xff] }
  0x43   :  { %178 = vmatprep.subr.mxu0 %v129_v13  ;;  %3941 = vmatprep.subr.mxu1 %v139_v23  ;;  %v107_v37 = vld [vmem:[#allocation2 + $0x30] sm:$0xff]  ;;  %v104_v40 = vld [vmem:[#allocation2 + $0x18] sm:$0xff]  ;;  %v121_v41 = vld [vmem:[#allocation2 + $0xa0] sm:$0xff] }
  0x44   :  { %179 = vmatpush1.msra.mxu0 %v128_v15  ;;  %3942 = vmatpush3.msra.mxu1 %v139_v23  ;;  %v102_v42 = vld [vmem:[#allocation2 + $0x8] sm:$0xff]  ;;  %v101_v43 = vld [vmem:[#allocation2] sm:$0xff]  ;;  %v115_v45 = vld [vmem:[#allocation2 + $0x70] sm:$0xff] }
  0x45   :  { %180 = vmatprep.subr.mxu0 %v126_v18  ;;  %3943 = vmatprep.subr.mxu1 %v136_v26  ;;  %v118_v44 = vld [vmem:[#allocation2 + $0x88] sm:$0xff]  ;;  %v112_v46 = vld [vmem:[#allocation2 + $0x58] sm:$0xff]  ;;  %v109_v48 = vld [vmem:[#allocation2 + $0x40] sm:$0xff] }
  0x46   :  { %181 = vmatpush1.msra.mxu0 %v125_v19  ;;  %3944 = vmatpush3.msra.mxu1 %v136_v26  ;;  %v100_v47 = vld [vmem:[%s4998_s0 + $0x8] sm:$0xff]  ;;  %v103_v50 = vld [vmem:[#allocation2 + $0x10] sm:$0xff]  ;;  %v149_v54 = vld [vmem:[%s5000_s2] sm:$0x7]  ;;  %s4392_s2 = smov 80  }
  0x47   :  { %182 = vmatprep.subr.mxu0 %v123_v21  ;;  %3945 = vmatprep.subr.mxu1 %v133_v29  ;;  %v106_v49 = vld [vmem:[#allocation2 + $0x28] sm:$0xff]  ;;  %v154_v56 = vrot.slane %v149_v54, %v153_v53  ;;  %v158_v57 = vrot.slane %v149_v54, %v157_v55  ;;  %v162_v5 = vrot.slane %v149_v54, %v161_v3 }
  0x48   :  { %183 = vmatpush1.msra.mxu0 %v122_v22  ;;  %3946 = vmatpush3.msra.mxu1 %v133_v29 }
  0x49   :  { %184 = vmatprep.subr.mxu0 %v120_v24  ;;  %3947 = vmatprep.subr.mxu1 %v130_v32 }
  0x4a   :  { %185 = vmatpush1.msra.mxu0 %v119_v25  ;;  %3948 = vmatpush3.msra.mxu1 %v130_v32 }
  0x4b   :  { %186 = vmatprep.subr.mxu0 %v117_v27  ;;  %3949 = vmatprep.subr.mxu1 %v127_v35 }
  0x4c   :  { %187 = vmatpush1.msra.mxu0 %v116_v28  ;;  %3950 = vmatpush3.msra.mxu1 %v127_v35 }
  0x4d   :  { %188 = vmatprep.subr.mxu0 %v114_v30  ;;  %3951 = vmatprep.subr.mxu1 %v124_v38 }
  0x4e   :  { %189 = vmatpush1.msra.mxu0 %v113_v31  ;;  %3952 = vmatpush3.msra.mxu1 %v124_v38 }
  0x4f   :  { %190 = vmatprep.subr.mxu0 %v111_v33  ;;  %3953 = vmatprep.subr.mxu1 %v121_v41 }
  0x50   :  { %191 = vmatpush1.msra.mxu0 %v110_v34  ;;  %3954 = vmatpush3.msra.mxu1 %v121_v41 }
  0x51   :  { %192 = vmatprep.subr.mxu0 %v108_v36  ;;  %3955 = vmatprep.subr.mxu1 %v118_v44 }
  0x52   :  { %193 = vmatpush1.msra.mxu0 %v107_v37  ;;  %3956 = vmatpush3.msra.mxu1 %v118_v44 }
  0x53   :  { %194 = vmatprep.subr.mxu0 %v105_v39  ;;  %3957 = vmatprep.subr.mxu1 %v115_v45 }
  0x54   :  { %195 = vmatpush1.msra.mxu0 %v104_v40  ;;  %3958 = vmatpush3.msra.mxu1 %v115_v45 }
  0x55   :  { %196 = vmatprep.subr.mxu0 %v102_v42  ;;  %3959 = vmatprep.subr.mxu1 %v112_v46 }
  0x56   :  { %197 = vmatpush1.msra.mxu0 %v101_v43  ;;  %3960 = vmatpush3.msra.mxu1 %v112_v46 }
  0x57   :  { %231 = vmatmul.mubr.f32.vlgmr.msra.gmra.mxu0 %v4489_v14  ;;  %3970 = vmatprep.subr.mxu0 %v4388_v0 }
  0x58   :  { %236 = vmatprep.mubr.f32.mxu0 %v4388_v0  ;;  %3961 = vmatprep.subr.mxu1 %v109_v48 }
  0x59   :  { %3962 = vmatpush3.msra.mxu1 %v109_v48 }
  0x5a   :  { %3963 = vmatprep.subr.mxu1 %v106_v49 }
  0x5b   :  { %237 = vmatmul.mubr.f32.gmra.mxu0 %v100_v47  ;;  %3964 = vmatpush3.msra.mxu1 %v106_v49 }
  0x5c   :  { %3965 = vmatprep.subr.mxu1 %v103_v50  ;;  %3972 = vmatprep.mubr.msk.f32.mxu0 %vm4389_vm0, %v4388_v0 }
  0x5d   :  { %3966 = vmatpush3.msra.mxu1 %v103_v50 }
  0x5e   :  { %3968 = vmatmul.mubr.f32.vlgmr.msra.gmra.mxu1 %v100_v47  ;;  %4000 = vmatprep.subr.mxu1 %v4388_v0 }
  0x5f   :  { %4002 = vmatprep.mubr.msk.f32.mxu1 %vm4389_vm0, %v4388_v0 }
 0x117   :  { %v232_v58 = vpop.f32.mrf.mxu0 }
 0x118   :  { %v233_v59 = vadd.f32 %v232_v58, %v154_v56 }
 0x119   :  { %v234_v60 = vpop.f32.mrf.mxu0 }
 0x11a   :  { %v235_v61 = vadd.f32 %v234_v60, %v158_v57  ;;  %324 = vrot.lane.b32.xlu1 %v233_v59, %s4390_s19  ;;  %320 = vrot.lane.b32.xlu0 %v233_v59, %s4391_s20 }
 0x11b   :  { %v238_v62 = vpop.f32.mrf.mxu0 }
 0x11c   :  { %v239_v63 = vadd.f32 %v238_v62, %v154_v56  ;;  %3971 = vmatpush3.xpose.msk.msra.mxu0 %vm422_vm1, %v235_v61 }
 0x11d   :  { %v240_v1 = vpop.f32.mrf.mxu0  ;;  %3975 = vmatprep.subr.mxu0 %v4388_v0 }
 0x11e   :  { %v241_v2 = vadd.f32 %v240_v1, %v158_v57  ;;  %322 = vrot.lane.b32.xlu1 %v239_v63, %s4391_s20  ;;  %328 = vrot.lane.b32.xlu0 %v233_v59, %s4392_s2  ;;  %v3969_v4 = vpop.f32.mrf.mxu1 }
 0x11f   :  { %3973 = vmatmul.mubr.msk.f32.vlgmr.msra.gmra.mxu0 %vm422_vm1, %v233_v59  ;;  %v4555_v7 = vadd.f32 %v3969_v4, %v162_v5 }
 0x120   :  { %3976 = vmatpush3.xpose.msk.msra.mxu0 %vm422_vm1, %v241_v2  ;;  %3977 = vmatprep.mubr.msk.f32.mxu0 %vm4389_vm0, %v4388_v0  ;;  %v309_v6 = vpop.f32.mrf.mxu1 }
 0x121   :  { %3980 = vmatprep.subr.mxu0 %v4388_v0  ;;  %v4557_v8 = vadd.f32 %v309_v6, %v162_v5 }
 0x122   :  { %326 = vrot.lane.b32.xlu1 %v239_v63, %s4390_s19  ;;  %332 = vrot.lane.b32.xlu0 %v233_v59, %s4393_s21 }
 0x123   :  { %3978 = vmatmul.mubr.msk.f32.vlgmr.msra.gmra.mxu0 %vm422_vm1, %v239_v63 }
 0x124   :  { %3982 = vmatprep.mubr.msk.f32.mxu0 %vm4389_vm0, %v4388_v0 }
 0x126   :  { %330 = vrot.lane.b32.xlu1 %v239_v63, %s4392_s2  ;;  %350 = vrot.lane.b32.xlu0 %v235_v61, %s4391_s20 }
 0x12a   :  { %334 = vrot.lane.b32.xlu1 %v239_v63, %s4393_s21  ;;  %354 = vrot.lane.b32.xlu0 %v235_v61, %s4390_s19 }
 0x12e   :  { %352 = vrot.lane.b32.xlu1 %v241_v2, %s4391_s20  ;;  %358 = vrot.lane.b32.xlu0 %v235_v61, %s4392_s2 }
 0x132   :  { %338 = vrot.lane.b32.xlu1 %v239_v63, %s4394_s22  ;;  %362 = vrot.lane.b32.xlu0 %v235_v61, %s4393_s21 }
 0x136   :  { %342 = vrot.lane.b32.xlu1 %v239_v63, %s4386_s25  ;;  %356 = vrot.lane.b32.xlu0 %v241_v2, %s4390_s19 }
 0x13a   :  { %360 = vrot.lane.b32.xlu1 %v241_v2, %s4392_s2  ;;  %366 = vrot.lane.b32.xlu0 %v235_v61, %s4394_s22 }
 0x13e   :  { %364 = vrot.lane.b32.xlu1 %v241_v2, %s4393_s21  ;;  %336 = vrot.lane.b32.xlu0 %v233_v59, %s4394_s22 }
 0x142   :  { %368 = vrot.lane.b32.xlu1 %v241_v2, %s4394_s22  ;;  %370 = vrot.lane.b32.xlu0 %v235_v61, %s4386_s25 }
 0x146   :  { %372 = vrot.lane.b32.xlu1 %v241_v2, %s4386_s25  ;;  %340 = vrot.lane.b32.xlu0 %v233_v59, %s4386_s25 }
 0x14a   :  { %376 = vrot.lane.b32.xlu1 %v241_v2, %s4395_s23  ;;  %374 = vrot.lane.b32.xlu0 %v235_v61, %s4395_s23 }
 0x14e   :  { %346 = vrot.lane.b32.xlu1 %v239_v63, %s4395_s23  ;;  %344 = vrot.lane.b32.xlu0 %v233_v59, %s4395_s23 }
 0x152   :  { %380 = vrot.lane.b32.xlu1 %v4557_v8, %s4391_s20  ;;  %382 = vrot.lane.b32.xlu0 %v4555_v7, %s4391_s20 }
 0x156   :  { %386 = vrot.lane.b32.xlu1 %v4557_v8, %s4390_s19  ;;  %392 = vrot.lane.b32.xlu0 %v4557_v8, %s4392_s2 }
 0x15a   :  { %388 = vrot.lane.b32.xlu1 %v4555_v7, %s4390_s19  ;;  %398 = vrot.lane.b32.xlu0 %v4557_v8, %s4393_s21 }
 0x15e   :  { %394 = vrot.lane.b32.xlu1 %v4555_v7, %s4392_s2 }
 0x18c   :  { %v325_v9 = vpop.permute.xlu1 %324  ;;  %v321_v10 = vpop.permute.xlu0 %320 }
 0x190   :  { %v323_v11 = vpop.permute.xlu1 %322  ;;  %v329_v12 = vpop.permute.xlu0 %328 }
 0x194   :  { %v327_v13 = vpop.permute.xlu1 %326  ;;  %v333_v14 = vpop.permute.xlu0 %332 }
 0x198   :  { %v331_v15 = vpop.permute.xlu1 %330  ;;  %v351_v16 = vpop.permute.xlu0 %350 }
 0x199   :  { %3981 = vmatpush3.xpose.msk.msra.mxu0 %vm422_vm1, %v351_v16 }
 0x19a   :  { %3985 = vmatprep.subr.mxu0 %v4388_v0 }
 0x19c   :  { %v335_v17 = vpop.permute.xlu1 %334  ;;  %v355_v18 = vpop.permute.xlu0 %354  ;;  %3983 = vmatmul.mubr.msk.f32.vlgmr.msra.gmra.mxu0 %vm422_vm1, %v321_v10 }
 0x19d   :  { %3987 = vmatprep.mubr.msk.f32.mxu0 %vm4389_vm0, %v4388_v0 }
 0x1a0   :  { %v353_v19 = vpop.permute.xlu1 %352  ;;  %v359_v20 = vpop.permute.xlu0 %358 }
 0x1a1   :  { %3986 = vmatpush3.xpose.msk.msra.mxu0 %vm422_vm1, %v353_v19  ;;  %4001 = vmatpush3.xpose.msk.msra.mxu1 %vm422_vm1, %v359_v20 }
 0x1a2   :  { %4010 = vmatprep.subr.mxu1 %v4388_v0  ;;  %3990 = vmatprep.subr.mxu0 %v4388_v0 }
 0x1a4   :  { %v339_v21 = vpop.permute.xlu1 %338  ;;  %4003 = vmatmul.mubr.msk.f32.vlgmr.msra.gmra.mxu1 %vm422_vm1, %v329_v12  ;;  %v363_v22 = vpop.permute.xlu0 %362  ;;  %3988 = vmatmul.mubr.msk.f32.vlgmr.msra.gmra.mxu0 %vm422_vm1, %v323_v11 }
 0x1a5   :  { %3991 = vmatpush3.xpose.msk.msra.mxu0 %vm422_vm1, %v355_v18  ;;  %4011 = vmatpush3.xpose.msk.msra.mxu1 %vm422_vm1, %v363_v22 }
 0x1a6   :  { %3992 = vmatprep.mubr.msk.f32.mxu0 %vm4389_vm0, %v4388_v0  ;;  %4012 = vmatprep.mubr.msk.f32.mxu1 %vm4389_vm0, %v4388_v0 }
 0x1a7   :  { %3995 = vmatprep.subr.mxu0 %v4388_v0  ;;  %4020 = vmatprep.subr.mxu1 %v4388_v0 }
 0x1a8   :  { %v343_v23 = vpop.permute.xlu1 %342  ;;  %4013 = vmatmul.mubr.msk.f32.vlgmr.msra.gmra.mxu1 %vm422_vm1, %v333_v14  ;;  %v357_v24 = vpop.permute.xlu0 %356  ;;  %3993 = vmatmul.mubr.msk.f32.vlgmr.msra.gmra.mxu0 %vm422_vm1, %v325_v9 }
 0x1a9   :  { %3996 = vmatpush3.xpose.msk.msra.mxu0 %vm422_vm1, %v357_v24  ;;  %3997 = vmatprep.mubr.msk.f32.mxu0 %vm4389_vm0, %v4388_v0 }
 0x1aa   :  { %4005 = vmatprep.subr.mxu0 %v4388_v0  ;;  %4022 = vmatprep.mubr.msk.f32.mxu1 %vm4389_vm0, %v4388_v0 }
 0x1ac   :  { %v361_v25 = vpop.permute.xlu1 %360  ;;  %v367_v26 = vpop.permute.xlu0 %366  ;;  %3998 = vmatmul.mubr.msk.f32.vlgmr.msra.gmra.mxu0 %vm422_vm1, %v327_v13 }
 0x1ad   :  { %4006 = vmatpush3.xpose.msk.msra.mxu0 %vm422_vm1, %v361_v25  ;;  %4021 = vmatpush3.xpose.msk.msra.mxu1 %vm422_vm1, %v367_v26 }
 0x1ae   :  { %4007 = vmatprep.mubr.msk.f32.mxu0 %vm4389_vm0, %v4388_v0  ;;  %4015 = vmatprep.subr.mxu0 %v4388_v0 }
 0x1af   :  { %4030 = vmatprep.subr.mxu1 %v4388_v0 }
 0x1b0   :  { %v365_v27 = vpop.permute.xlu1 %364  ;;  %v337_v28 = vpop.permute.xlu0 %336  ;;  %4008 = vmatmul.mubr.msk.f32.vlgmr.msra.gmra.mxu0 %vm422_vm1, %v331_v15 }
 0x1b1   :  { %4016 = vmatpush3.xpose.msk.msra.mxu0 %vm422_vm1, %v365_v27  ;;  %4023 = vmatmul.mubr.msk.f32.vlgmr.msra.gmra.mxu1 %vm422_vm1, %v337_v28 }
 0x1b2   :  { %4017 = vmatprep.mubr.msk.f32.mxu0 %vm4389_vm0, %v4388_v0  ;;  %4025 = vmatprep.subr.mxu0 %v4388_v0 }
 0x1b3   :  { %4032 = vmatprep.mubr.msk.f32.mxu1 %vm4389_vm0, %v4388_v0 }
 0x1b4   :  { %v369_v29 = vpop.permute.xlu1 %368  ;;  %v371_v30 = vpop.permute.xlu0 %370  ;;  %4018 = vmatmul.mubr.msk.f32.vlgmr.msra.gmra.mxu0 %vm422_vm1, %v335_v17 }
 0x1b5   :  { %4026 = vmatpush3.xpose.msk.msra.mxu0 %vm422_vm1, %v369_v29  ;;  %4031 = vmatpush3.xpose.msk.msra.mxu1 %vm422_vm1, %v371_v30 }
 0x1b6   :  { %4027 = vmatprep.mubr.msk.f32.mxu0 %vm4389_vm0, %v4388_v0  ;;  %4035 = vmatprep.subr.mxu0 %v4388_v0 }
 0x1b7   :  { %4040 = vmatprep.subr.mxu1 %v4388_v0 }
 0x1b8   :  { %v373_v31 = vpop.permute.xlu1 %372  ;;  %v341_v32 = vpop.permute.xlu0 %340  ;;  %4028 = vmatmul.mubr.msk.f32.vlgmr.msra.gmra.mxu0 %vm422_vm1, %v339_v21 }
 0x1b9   :  { %4033 = vmatmul.mubr.msk.f32.vlgmr.msra.gmra.mxu1 %vm422_vm1, %v341_v32  ;;  %4036 = vmatpush3.xpose.msk.msra.mxu0 %vm422_vm1, %v373_v31 }
 0x1ba   :  { %4037 = vmatprep.mubr.msk.f32.mxu0 %vm4389_vm0, %v4388_v0  ;;  %4045 = vmatprep.subr.mxu0 %v4388_v0 }
 0x1bb   :  { %4042 = vmatprep.mubr.msk.f32.mxu1 %vm4389_vm0, %v4388_v0 }
 0x1bc   :  { %v377_v33 = vpop.permute.xlu1 %376  ;;  %v375_v34 = vpop.permute.xlu0 %374  ;;  %4038 = vmatmul.mubr.msk.f32.vlgmr.msra.gmra.mxu0 %vm422_vm1, %v343_v23 }
 0x1bd   :  { %4041 = vmatpush3.xpose.msk.msra.mxu1 %vm422_vm1, %v375_v34  ;;  %4046 = vmatpush3.xpose.msk.msra.mxu0 %vm422_vm1, %v377_v33 }
 0x1be   :  { %4047 = vmatprep.mubr.msk.f32.mxu0 %vm4389_vm0, %v4388_v0  ;;  %4050 = vmatprep.subr.mxu1 %v4388_v0 }
 0x1bf   :  { %4055 = vmatprep.subr.mxu0 %v4388_v0 }
 0x1c0   :  { %v347_v35 = vpop.permute.xlu1 %346  ;;  %v345_v36 = vpop.permute.xlu0 %344 }
 0x1c1   :  { %4043 = vmatmul.mubr.msk.f32.vlgmr.msra.gmra.mxu1 %vm422_vm1, %v345_v36  ;;  %4048 = vmatmul.mubr.msk.f32.vlgmr.msra.gmra.mxu0 %vm422_vm1, %v347_v35 }
 0x1c2   :  { %4051 = vmatpush3.msra.mxu1 %v4557_v8  ;;  %4056 = vmatpush3.msra.mxu0 %v4555_v7 }
 0x1c3   :  { %4057 = vmatprep.mubr.msk.f32.mxu0 %vm4389_vm0, %v4388_v0  ;;  %4065 = vmatprep.subr.mxu0 %v4388_v0 }
 0x1c4   :  { %4052 = vmatprep.mubr.msk.f32.mxu1 %vm4389_vm0, %v4388_v0  ;;  %4060 = vmatprep.subr.mxu1 %v4388_v0 }
 0x1df   :  { %v493_v37 = vpop.f32.mrf.mxu0 }
 0x1e0   :  { %v4647_v38 = vmul.f32 0.25, %v493_v37 }
 0x1e1   :  { %v3974_v39 = vpop.f32.mrf.mxu0 }
 0x1e2   :  { %v1624_v40 = vsel %vm1623_vm2, %v4647_v38, -inf  ;;  %v4701_v39 = vpop.permute.xlu1 %380 }
 0x1e3   :  { %1625 = vmax.xlane.f32.xlu0 %v1624_v40  ;;  %v567_v41 = vpop.f32.mrf.mxu0 }
 0x1e4   :  { %v4651_v42 = vmul.f32 0.25, %v567_v41 }
 0x1e5   :  { %v3979_v43 = vpop.f32.mrf.mxu0 }
 0x1e6   :  { %v1627_v44 = vsel %vm1623_vm2, %v4651_v42, -inf  ;;  %v4703_v40 = vpop.permute.xlu1 %386 }
 0x1e7   :  { %1628 = vmax.xlane.f32.xlu1 %v1627_v44 }
 0x1ea   :  { %v4705_v41 = vpop.permute.xlu1 %388 }
 0x1ee   :  { %v4709_v43 = vpop.permute.xlu1 %394 }
 0x25c   :  { %v641_v45 = vpop.f32.mrf.mxu0 }
 0x25d   :  { %v4655_v46 = vmul.f32 0.25, %v641_v45 }
 0x25e   :  { %v3984_v47 = vpop.f32.mrf.mxu0 }
 0x25f   :  { %v1630_v48 = vsel %vm1623_vm2, %v4655_v46, -inf }
 0x260   :  { %1631 = vmax.xlane.f32.xlu0 %v1630_v48 }
 0x264   :  { %v937_v49 = vpop.f32.mrf.mxu1  ;;  %v715_v50 = vpop.f32.mrf.mxu0 }
 0x265   :  { %v4659_v51 = vmul.f32 0.25, %v937_v49  ;;  %v4661_v54 = vmul.f32 0.25, %v715_v50 }
 0x266   :  { %v3989_v56 = vpop.f32.mrf.mxu0  ;;  %v4004_v57 = vpop.f32.mrf.mxu1 }
 0x267   :  { %v1642_v58 = vsel %vm1623_vm2, %v4659_v51, -inf  ;;  %v1633_v59 = vsel %vm1623_vm2, %v4661_v54, -inf }
 0x268   :  { %v1085_v60 = vpop.f32.mrf.mxu1  ;;  %1643 = vmax.xlane.f32.xlu1 %v1642_v58  ;;  %1634 = vmax.xlane.f32.xlu0 %v1633_v59  ;;  %v789_v61 = vpop.f32.mrf.mxu0 }
 0x269   :  { %v4667_v62 = vmul.f32 0.25, %v1085_v60  ;;  %v4669_v2 = vmul.f32 0.25, %v789_v61  ;;  %v4726_v59 = vpop.permute.xlu0 %382 }
 0x26a   :  { %v3994_v63 = vpop.f32.mrf.mxu0  ;;  %v4014_v1 = vpop.f32.mrf.mxu1 }
 0x26b   :  { %v1648_v4 = vsel %vm1623_vm2, %v4667_v62, -inf  ;;  %v1636_v10 = vsel %vm1623_vm2, %v4669_v2, -inf }
 0x26c   :  { %1649 = vmax.xlane.f32.xlu1 %v1648_v4  ;;  %v863_v5 = vpop.f32.mrf.mxu0 }
 0x26d   :  { %v4673_v6 = vmul.f32 0.25, %v863_v5  ;;  %v4732_v61 = vpop.permute.xlu0 %392 }
 0x26e   :  { %v3999_v9 = vpop.f32.mrf.mxu0 }
 0x26f   :  { %v1639_v11 = vsel %vm1623_vm2, %v4673_v6, -inf }
 0x270   :  { %1637 = vmax.xlane.f32.xlu1 %v1636_v10  ;;  %1640 = vmax.xlane.f32.xlu0 %v1639_v11  ;;  %v1011_v12 = vpop.f32.mrf.mxu0  ;;  %v1629_v45 = vpop.xlane.xlu1 %1628 }
 0x271   :  { %v4679_v13 = vmul.f32 0.25, %v1011_v12  ;;  %v1233_v14 = vpop.f32.mrf.mxu1  ;;  %v1673_v49 = vsub.f32 %v4651_v42, %v1629_v45  ;;  %v4738_v63 = vpop.permute.xlu0 %398 }
 0x272   :  { %v4009_v15 = vpop.f32.mrf.mxu0  ;;  %v4713_v44 = vmul.f32 0.25, %v1233_v14 }
 0x273   :  { %v4024_v16 = vpop.f32.mrf.mxu1  ;;  %v1645_v17 = vsel %vm1623_vm2, %v4679_v13, -inf  ;;  %v1690_v57 = vmul.f32 1.442695, %v1673_v49 }
 0x274   :  { %1646 = vmax.xlane.f32.xlu0 %v1645_v17  ;;  %v1159_v18 = vpop.f32.mrf.mxu0  ;;  %v1654_v48 = vsel %vm1623_vm2, %v4713_v44, -inf }
 0x275   :  { %v4683_v19 = vmul.f32 0.25, %v1159_v18  ;;  %4218 = vpow2.f32 %v1690_v57  ;;  %v1626_v1 = vpop.xlane.xlu0 %1625 }
 0x276   :  { %v4019_v20 = vpop.f32.mrf.mxu0  ;;  %v1672_v4 = vsub.f32 %v4647_v38, %v1626_v1 }
 0x277   :  { %v1651_v21 = vsel %vm1623_vm2, %v4683_v19, -inf }
 0x278   :  { %1652 = vmax.xlane.f32.xlu0 %v1651_v21  ;;  %v1307_v22 = vpop.f32.mrf.mxu0  ;;  %v1688_v5 = vmul.f32 1.442695, %v1672_v4 }
 0x279   :  { %v4687_v23 = vmul.f32 0.25, %v1307_v22  ;;  %v1381_v24 = vpop.f32.mrf.mxu1 }
 0x27a   :  { %v4029_v25 = vpop.f32.mrf.mxu0  ;;  %v4715_v47 = vmul.f32 0.25, %v1381_v24  ;;  %4220 = vpow2.f32 %v1688_v5 }
 0x27b   :  { %v4034_v26 = vpop.f32.mrf.mxu1  ;;  %v1657_v27 = vsel %vm1623_vm2, %v4687_v23, -inf }
 0x27c   :  { %1658 = vmax.xlane.f32.xlu0 %v1657_v27  ;;  %v1455_v28 = vpop.f32.mrf.mxu0  ;;  %v1660_v56 = vsel %vm1623_vm2, %v4715_v47, -inf }
 0x27d   :  { %v4691_v29 = vmul.f32 0.25, %v1455_v28 }
 0x27e   :  { %v4039_v30 = vpop.f32.mrf.mxu0 }
 0x27f   :  { %v1663_v31 = vsel %vm1623_vm2, %v4691_v29, -inf }
 0x280   :  { %1664 = vmax.xlane.f32.xlu0 %v1663_v31 }
 0x281   :  { %v1529_v32 = vpop.f32.mrf.mxu1  ;;  %400 = vrot.lane.b32.xlu1 %v4555_v7, %s4393_s21  ;;  %v1603_v33 = vpop.f32.mrf.mxu0 }
 0x282   :  { %v4697_v34 = vmul.f32 0.25, %v1603_v33  ;;  %v4720_v50 = vmul.f32 0.25, %v1529_v32  ;;  %v4728_v60 = vpop.eup %4218 }
 0x283   :  { %v4044_v35 = vpop.f32.mrf.mxu1  ;;  %v4049_v36 = vpop.f32.mrf.mxu0  ;;  %v1723_v42 = vsel %vm1623_vm2, %v4728_v60, 0.0 }
 0x284   :  { %v1669_v37 = vsel %vm1623_vm2, %v4697_v34, -inf  ;;  %v1666_v58 = vsel %vm1623_vm2, %v4720_v50, -inf }
 0x285   :  { %1670 = vmax.xlane.f32.xlu0 %v1669_v37 }
 0x287   :  { %v4741_v9 = vpop.eup %4220 }
 0x288   :  { %v1720_v10 = vsel %vm1623_vm2, %v4741_v9, 0.0 }
 0x29b   :  { %404 = vrot.lane.b32.xlu0 %v4557_v8, %s4394_s22 }
 0x29f   :  { %410 = vrot.lane.b32.xlu0 %v4557_v8, %s4386_s25 }
 0x2a5   :  { %1655 = vmax.xlane.f32.xlu1 %v1654_v48 }
 0x2a9   :  { %1661 = vmax.xlane.f32.xlu1 %v1660_v56 }
 0x2ad   :  { %1667 = vmax.xlane.f32.xlu1 %v1666_v58 }
 0x2be   :  { %406 = vrot.lane.b32.xlu1 %v4555_v7, %s4394_s22  ;;  %1724 = vadd.xlane.f32.xlu0 %v1723_v42 }
 0x2c2   :  { %412 = vrot.lane.b32.xlu1 %v4555_v7, %s4386_s25 }
 0x2e6   :  { %1721 = vadd.xlane.f32.xlu1 %v1720_v10 }
 0x2e9   :  { %v1632_v11 = vpop.xlane.xlu0 %1631 }
 0x2ea   :  { %v1674_v12 = vsub.f32 %v4655_v46, %v1632_v11 }
 0x2ec   :  { %v1692_v14 = vmul.f32 1.442695, %v1674_v12 }
 0x2ee   :  { %4222 = vpow2.f32 %v1692_v14 }
 0x2f1   :  { %v1644_v15 = vpop.xlane.xlu1 %1643  ;;  %v1635_v16 = vpop.xlane.xlu0 %1634 }
 0x2f2   :  { %v1678_v17 = vsub.f32 %v4659_v51, %v1644_v15  ;;  %v1675_v18 = vsub.f32 %v4661_v54, %v1635_v16 }
 0x2f4   :  { %v1700_v38 = vmul.f32 1.442695, %v1678_v17  ;;  %v1694_v20 = vmul.f32 1.442695, %v1675_v18 }
 0x2f5   :  { %v1650_v21 = vpop.xlane.xlu1 %1649 }
 0x2f6   :  { %4224 = vpow2.f32 %v1700_v38  ;;  %v1680_v22 = vsub.f32 %v4667_v62, %v1650_v21 }
 0x2f7   :  { %4226 = vpow2.f32 %v1694_v20 }
 0x2f8   :  { %v1704_v24 = vmul.f32 1.442695, %v1680_v22 }
 0x2f9   :  { %v1638_v25 = vpop.xlane.xlu1 %1637  ;;  %v1641_v26 = vpop.xlane.xlu0 %1640 }
 0x2fa   :  { %4228 = vpow2.f32 %v1704_v24  ;;  %v1676_v46 = vsub.f32 %v4669_v2, %v1638_v25  ;;  %v1677_v27 = vsub.f32 %v4673_v6, %v1641_v26 }
 0x2fb   :  { %v4751_v28 = vpop.eup %4222 }
 0x2fc   :  { %v1696_v51 = vmul.f32 1.442695, %v1676_v46  ;;  %v1698_v30 = vmul.f32 1.442695, %v1677_v27  ;;  %v1726_v54 = vsel %vm1623_vm2, %v4751_v28, 0.0 }
 0x2fd   :  { %1727 = vadd.xlane.f32.xlu1 %v1726_v54  ;;  %v1647_v31 = vpop.xlane.xlu0 %1646  ;;  %v4800_v22 = vpop.permute.xlu1 %400 }
 0x2fe   :  { %4230 = vpow2.f32 %v1696_v51  ;;  %v1679_v62 = vsub.f32 %v4679_v13, %v1647_v31 }
 0x2ff   :  { %4232 = vpow2.f32 %v1698_v30 }
 0x300   :  { %v1702_v32 = vmul.f32 1.442695, %v1679_v62 }
 0x301   :  { %v1653_v33 = vpop.xlane.xlu0 %1652 }
 0x302   :  { %4234 = vpow2.f32 %v1702_v32  ;;  %v1681_v2 = vsub.f32 %v4683_v19, %v1653_v33 }
 0x303   :  { %v4757_v35 = vpop.eup %4224 }
 0x304   :  { %v4759_v6 = vpop.eup %4226  ;;  %v1706_v36 = vmul.f32 1.442695, %v1681_v2  ;;  %v1738_v37 = vsel %vm1623_vm2, %v4757_v35, 0.0 }
 0x305   :  { %1739 = vadd.xlane.f32.xlu1 %v1738_v37  ;;  %v1659_v45 = vpop.xlane.xlu0 %1658  ;;  %v1729_v48 = vsel %vm1623_vm2, %v4759_v6, 0.0 }
 0x306   :  { %4236 = vpow2.f32 %v1706_v36  ;;  %v1683_v13 = vsub.f32 %v4687_v23, %v1659_v45  ;;  %1730 = vadd.xlane.f32.xlu0 %v1729_v48 }
 0x307   :  { %v4766_v49 = vpop.eup %4228 }
 0x308   :  { %v1710_v19 = vmul.f32 1.442695, %v1683_v13  ;;  %v1744_v56 = vsel %vm1623_vm2, %v4766_v49, 0.0 }
 0x309   :  { %1745 = vadd.xlane.f32.xlu1 %v1744_v56  ;;  %v1665_v57 = vpop.xlane.xlu0 %1664 }
 0x30a   :  { %4238 = vpow2.f32 %v1710_v19  ;;  %v1685_v58 = vsub.f32 %v4691_v29, %v1665_v57 }
 0x30b   :  { %v4771_v42 = vpop.eup %4230 }
 0x30c   :  { %v4773_v1 = vpop.eup %4232  ;;  %v1714_v4 = vmul.f32 1.442695, %v1685_v58  ;;  %v1732_v23 = vsel %vm1623_vm2, %v4771_v42, 0.0 }
 0x30d   :  { %1733 = vadd.xlane.f32.xlu1 %v1732_v23  ;;  %v1735_v5 = vsel %vm1623_vm2, %v4773_v1, 0.0 }
 0x30e   :  { %4240 = vpow2.f32 %v1714_v4  ;;  %1736 = vadd.xlane.f32.xlu0 %v1735_v5  ;;  %v1671_v10 = vpop.xlane.xlu0 %1670 }
 0x30f   :  { %v4779_v11 = vpop.eup %4234  ;;  %v1687_v12 = vsub.f32 %v4697_v34, %v1671_v10 }
 0x310   :  { %v1741_v29 = vsel %vm1623_vm2, %v4779_v11, 0.0 }
 0x311   :  { %v1718_v14 = vmul.f32 1.442695, %v1687_v12 }
 0x312   :  { %1742 = vadd.xlane.f32.xlu0 %v1741_v29  ;;  %v4807_v62 = vpop.permute.xlu0 %404 }
 0x313   :  { %v4784_v15 = vpop.eup %4236  ;;  %4242 = vpow2.f32 %v1718_v14 }
 0x314   :  { %v1747_v16 = vsel %vm1623_vm2, %v4784_v15, 0.0 }
 0x316   :  { %1748 = vadd.xlane.f32.xlu0 %v1747_v16  ;;  %v4813_v33 = vpop.permute.xlu0 %410 }
 0x317   :  { %v4788_v17 = vpop.eup %4238 }
 0x318   :  { %v1753_v18 = vsel %vm1623_vm2, %v4788_v17, 0.0 }
 0x31a   :  { %1754 = vadd.xlane.f32.xlu0 %v1753_v18 }
 0x31b   :  { %v4792_v38 = vpop.eup %4240 }
 0x31c   :  { %v1759_v34 = vsel %vm1623_vm2, %v4792_v38, 0.0 }
 0x31e   :  { %1760 = vadd.xlane.f32.xlu0 %v1759_v34 }
 0x320   :  { %v4796_v20 = vpop.eup %4242 }
 0x321   :  { %v1765_v21 = vsel %vm1623_vm2, %v4796_v20, 0.0 }
 0x322   :  { %1766 = vadd.xlane.f32.xlu0 %v1765_v21 }
 0x32e   :  { %v1656_v24 = vpop.xlane.xlu1 %1655 }
 0x32f   :  { %v1682_v25 = vsub.f32 %v4713_v44, %v1656_v24 }
 0x331   :  { %v1708_v26 = vmul.f32 1.442695, %v1682_v25 }
 0x332   :  { %v1662_v46 = vpop.xlane.xlu1 %1661 }
 0x333   :  { %4244 = vpow2.f32 %v1708_v26  ;;  %v1684_v27 = vsub.f32 %v4715_v47, %v1662_v46 }
 0x335   :  { %v1712_v51 = vmul.f32 1.442695, %v1684_v27 }
 0x336   :  { %v1668_v30 = vpop.xlane.xlu1 %1667 }
 0x337   :  { %4246 = vpow2.f32 %v1712_v51  ;;  %v1686_v54 = vsub.f32 %v4720_v50, %v1668_v30 }
 0x338   :  { %416 = vrot.lane.b32.xlu0 %v4557_v8, %s4395_s23 }
 0x339   :  { %v1716_v31 = vmul.f32 1.442695, %v1686_v54 }
 0x33a   :  { %v4831_v48 = vpop.permute.xlu1 %406 }
 0x33b   :  { %4248 = vpow2.f32 %v1716_v31 }
 0x33e   :  { %v4833_v13 = vpop.permute.xlu1 %412 }
 0x340   :  { %v4809_v32 = vpop.eup %4244 }
 0x341   :  { %v1750_v44 = vsel %vm1623_vm2, %v4809_v32, 0.0 }
 0x342   :  { %1751 = vadd.xlane.f32.xlu1 %v1750_v44 }
 0x344   :  { %v4815_v47 = vpop.eup %4246 }
 0x345   :  { %v1756_v50 = vsel %vm1623_vm2, %v4815_v47, 0.0 }
 0x346   :  { %1757 = vadd.xlane.f32.xlu1 %v1756_v50 }
 0x347   :  { %v1725_v2 = vpop.xlane.xlu0 %1724 }
 0x348   :  { %v4819_v8 = vpop.eup %4248  ;;  %4250 = vrcp.f32 %v1725_v2 }
 0x349   :  { %v1762_v36 = vsel %vm1623_vm2, %v4819_v8, 0.0 }
 0x34a   :  { %1763 = vadd.xlane.f32.xlu1 %v1762_v36 }
 0x355   :  { %v4251_v37 = vpop.eup %4250 }
 0x356   :  { %v1771_v45 = vmul.f32 %v4251_v37, %v4728_v60 }
 0x358   :  { %4058 = vmatmul.mubr.msk.f32.vlgmr.msra.gmra.mxu0 %vm1623_vm2, %v1771_v45 }
 0x359   :  { %4066 = vmatpush3.msra.mxu0 %v4726_v59  ;;  %4067 = vmatprep.mubr.msk.f32.mxu0 %vm4389_vm0, %v4388_v0 }
 0x35a   :  { %4075 = vmatprep.subr.mxu0 %v4388_v0 }
 0x35b   :  { %418 = vrot.lane.b32.xlu1 %v4555_v7, %s4395_s23 }
 0x36f   :  { %v1722_v19 = vpop.xlane.xlu1 %1721 }
 0x370   :  { %4252 = vrcp.f32 %v1722_v19  ;;  %v3059_v19 = vld [vmem:[#allocation4 + $0x78] sm:$0xff] }
 0x37d   :  { %v4253_v56 = vpop.eup %4252 }
 0x37e   :  { %v1769_v60 = vmul.f32 %v4253_v56, %v4741_v9  ;;  %v3058_v56 = vld [vmem:[#allocation4 + $0x70] sm:$0xff] }
 0x380   :  { %4053 = vmatmul.mubr.msk.f32.vlgmr.msra.gmra.mxu1 %vm1623_vm2, %v1769_v60 }
 0x381   :  { %4061 = vmatpush3.msra.mxu1 %v4701_v39  ;;  %4062 = vmatprep.mubr.msk.f32.mxu1 %vm4389_vm0, %v4388_v0 }
 0x382   :  { %4070 = vmatprep.subr.mxu1 %v4388_v0 }
 0x386   :  { %v1728_v59 = vpop.xlane.xlu1 %1727 }
 0x387   :  { %4254 = vrcp.f32 %v1728_v59 }
 0x38e   :  { %v1740_v7 = vpop.xlane.xlu1 %1739 }
 0x38f   :  { %v1731_v57 = vpop.xlane.xlu0 %1730 }
 0x390   :  { %4256 = vrcp.f32 %v1731_v57 }
 0x392   :  { %v1746_v58 = vpop.xlane.xlu1 %1745 }
 0x394   :  { %v4255_v4 = vpop.eup %4254 }
 0x395   :  { %v1773_v23 = vmul.f32 %v4255_v4, %v4751_v28  ;;  %v3056_v4 = vld [vmem:[#allocation4 + $0x60] sm:$0xff] }
 0x396   :  { %v1734_v5 = vpop.xlane.xlu1 %1733 }
 0x397   :  { %4258 = vrcp.f32 %v1734_v5  ;;  %v1737_v9 = vpop.xlane.xlu0 %1736  ;;  %4063 = vmatmul.mubr.msk.f32.vlgmr.msra.gmra.mxu1 %vm1623_vm2, %v1773_v23 }
 0x398   :  { %4260 = vrcp.f32 %v1737_v9  ;;  %4071 = vmatpush3.msra.mxu1 %v4703_v40  ;;  %4072 = vmatprep.mubr.msk.f32.mxu1 %vm4389_vm0, %v4388_v0 }
 0x399   :  { %4262 = vrcp.f32 %v1740_v7  ;;  %4080 = vmatprep.subr.mxu1 %v4388_v0  ;;  %v3057_v7 = vld [vmem:[#allocation4 + $0x68] sm:$0xff] }
 0x39b   :  { %v1743_v39 = vpop.xlane.xlu0 %1742 }
 0x39c   :  { %4264 = vrcp.f32 %v1743_v39  ;;  %v3055_v39 = vld [vmem:[#allocation4 + $0x58] sm:$0xff] }
 0x39d   :  { %v4257_v10 = vpop.eup %4256  ;;  %4266 = vrcp.f32 %v1746_v58 }
 0x39e   :  { %v1775_v28 = vmul.f32 %v4257_v10, %v4759_v6 }
 0x39f   :  { %v1749_v12 = vpop.xlane.xlu0 %1748 }
 0x3a0   :  { %4268 = vrcp.f32 %v1749_v12  ;;  %4068 = vmatmul.mubr.msk.f32.vlgmr.msra.gmra.mxu0 %vm1623_vm2, %v1775_v28  ;;  %v3054_v12 = vld [vmem:[#allocation4 + $0x50] sm:$0xff] }
 0x3a1   :  { %4076 = vmatpush3.msra.mxu0 %v4705_v41  ;;  %4077 = vmatprep.mubr.msk.f32.mxu0 %vm4389_vm0, %v4388_v0 }
 0x3a2   :  { %4085 = vmatprep.subr.mxu0 %v4388_v0 }
 0x3a3   :  { %v1755_v40 = vpop.xlane.xlu0 %1754 }
 0x3a4   :  { %v4259_v29 = vpop.eup %4258  ;;  %4270 = vrcp.f32 %v1755_v40 }
 0x3a5   :  { %v4261_v14 = vpop.eup %4260  ;;  %v1777_v16 = vmul.f32 %v4259_v29, %v4771_v42 }
 0x3a6   :  { %v4263_v18 = vpop.eup %4262  ;;  %v1779_v6 = vmul.f32 %v4261_v14, %v4773_v1 }
 0x3a7   :  { %v1761_v34 = vpop.xlane.xlu0 %1760  ;;  %4073 = vmatmul.mubr.msk.f32.vlgmr.msra.gmra.mxu1 %vm1623_vm2, %v1777_v16  ;;  %v1781_v21 = vmul.f32 %v4263_v18, %v4757_v35  ;;  %v3053_v16 = vld [vmem:[#allocation4 + $0x48] sm:$0xff] }
 0x3a8   :  { %4272 = vrcp.f32 %v1761_v34  ;;  %4078 = vmatmul.mubr.msk.f32.vlgmr.msra.gmra.mxu0 %vm1623_vm2, %v1779_v6  ;;  %4081 = vmatpush3.msra.mxu1 %v4732_v61  ;;  %v3052_v6 = vld [vmem:[#allocation4 + $0x40] sm:$0xff] }
 0x3a9   :  { %v4265_v41 = vpop.eup %4264  ;;  %4086 = vmatpush3.msra.mxu0 %v4709_v43  ;;  %4082 = vmatprep.mubr.msk.f32.mxu1 %vm4389_vm0, %v4388_v0 }
 0x3aa   :  { %v4267_v42 = vpop.eup %4266  ;;  %4087 = vmatprep.mubr.msk.f32.mxu0 %vm4389_vm0, %v4388_v0  ;;  %4090 = vmatprep.subr.mxu1 %v4388_v0  ;;  %v1783_v1 = vmul.f32 %v4265_v41, %v4779_v11  ;;  %v3051_v41 = vld [vmem:[#allocation4 + $0x38] sm:$0xff] }
 0x3ab   :  { %4095 = vmatprep.subr.mxu0 %v4388_v0  ;;  %4083 = vmatmul.mubr.msk.f32.vlgmr.msra.gmra.mxu1 %vm1623_vm2, %v1781_v21  ;;  %v1785_v61 = vmul.f32 %v4267_v42, %v4766_v49  ;;  %v3050_v42 = vld [vmem:[#allocation4 + $0x30] sm:$0xff] }
 0x3ac   :  { %4088 = vmatmul.mubr.msk.f32.vlgmr.msra.gmra.mxu0 %vm1623_vm2, %v1783_v1  ;;  %4091 = vmatpush3.msra.mxu1 %v4738_v63 }
 0x3ad   :  { %v4269_v43 = vpop.eup %4268  ;;  %4096 = vmatpush3.msra.mxu0 %v4800_v22  ;;  %4092 = vmatprep.mubr.msk.f32.mxu1 %vm4389_vm0, %v4388_v0 }
 0x3ae   :  { %4097 = vmatprep.mubr.msk.f32.mxu0 %vm4389_vm0, %v4388_v0  ;;  %4100 = vmatprep.subr.mxu1 %v4388_v0  ;;  %v1787_v35 = vmul.f32 %v4269_v43, %v4784_v15  ;;  %v3049_v43 = vld [vmem:[#allocation4 + $0x28] sm:$0xff] }
 0x3af   :  { %4105 = vmatprep.subr.mxu0 %v4388_v0  ;;  %4093 = vmatmul.mubr.msk.f32.vlgmr.msra.gmra.mxu1 %vm1623_vm2, %v1785_v61  ;;  %v3048_v61 = vld [vmem:[#allocation4 + $0x20] sm:$0xff] }
 0x3b0   :  { %4098 = vmatmul.mubr.msk.f32.vlgmr.msra.gmra.mxu0 %vm1623_vm2, %v1787_v35  ;;  %4101 = vmatpush3.msra.mxu1 %v4807_v62  ;;  %v3047_v35 = vld [vmem:[#allocation4 + $0x18] sm:$0xff] }
 0x3b1   :  { %v4271_v63 = vpop.eup %4270  ;;  %4106 = vmatpush3.msra.mxu0 %v4831_v48  ;;  %4107 = vmatprep.mubr.msk.f32.mxu0 %vm4389_vm0, %v4388_v0 }
 0x3b2   :  { %4115 = vmatprep.subr.mxu0 %v4388_v0  ;;  %v1791_v49 = vmul.f32 %v4271_v63, %v4788_v17  ;;  %4102 = vmatprep.mubr.msk.f32.mxu1 %vm4389_vm0, %v4388_v0  ;;  %v1767_v17 = vpop.xlane.xlu0 %1766  ;;  %v3046_v63 = vld [vmem:[#allocation4 + $0x10] sm:$0xff] }
 0x3b3   :  { %4110 = vmatprep.subr.mxu1 %v4388_v0  ;;  %4274 = vrcp.f32 %v1767_v17  ;;  %v3044_v17 = vld [vmem:[#allocation4] sm:$0xff] }
 0x3b4   :  { %4108 = vmatmul.mubr.msk.f32.vlgmr.msra.gmra.mxu0 %vm1623_vm2, %v1791_v49 }
 0x3b5   :  { %v4273_v11 = vpop.eup %4272  ;;  %4116 = vmatpush3.msra.mxu0 %v4833_v13  ;;  %4117 = vmatprep.mubr.msk.f32.mxu0 %vm4389_vm0, %v4388_v0 }
 0x3b6   :  { %v1795_v15 = vmul.f32 %v4273_v11, %v4792_v38  ;;  %4125 = vmatprep.subr.mxu0 %v4388_v0  ;;  %v417_v54 = vpop.permute.xlu0 %416  ;;  %v3045_v11 = vld [vmem:[#allocation4 + $0x8] sm:$0xff] }
 0x3b8   :  { %4118 = vmatmul.mubr.msk.f32.vlgmr.msra.gmra.mxu0 %vm1623_vm2, %v1795_v15 }
 0x3b9   :  { %4127 = vmatprep.mubr.msk.f32.mxu0 %vm4389_vm0, %v4388_v0 }
 0x3c0   :  { %v4275_v26 = vpop.eup %4274 }
 0x3c1   :  { %v1799_v27 = vmul.f32 %v4275_v26, %v4796_v20 }
 0x3cb   :  { %v1752_v22 = vpop.xlane.xlu1 %1751 }
 0x3cc   :  { %4276 = vrcp.f32 %v1752_v22 }
 0x3cf   :  { %v1758_v24 = vpop.xlane.xlu1 %1757 }
 0x3d0   :  { %4278 = vrcp.f32 %v1758_v24 }
 0x3d3   :  { %v1764_v25 = vpop.xlane.xlu1 %1763 }
 0x3d4   :  { %4280 = vrcp.f32 %v1764_v25 }
 0x3d7   :  { %v419_v46 = vpop.permute.xlu1 %418 }
 0x3d8   :  { %4126 = vmatpush3.msra.mxu0 %v419_v46 }
 0x3d9   :  { %v4277_v38 = vpop.eup %4276  ;;  %4128 = vmatmul.mubr.msk.f32.vlgmr.msra.gmra.mxu0 %vm1623_vm2, %v1799_v27 }
 0x3da   :  { %v1789_v51 = vmul.f32 %v4277_v38, %v4809_v32  ;;  %3335 = vmatprep.mubr.f32.mxu0 %v4388_v0 }
 0x3dc   :  { %4103 = vmatmul.mubr.msk.f32.vlgmr.msra.gmra.mxu1 %vm1623_vm2, %v1789_v51 }
 0x3dd   :  { %v4279_v30 = vpop.eup %4278  ;;  %4111 = vmatpush3.msra.mxu1 %v4813_v33  ;;  %4112 = vmatprep.mubr.msk.f32.mxu1 %vm4389_vm0, %v4388_v0 }
 0x3de   :  { %4120 = vmatprep.subr.mxu1 %v4388_v0  ;;  %v1793_v20 = vmul.f32 %v4279_v30, %v4815_v47 }
 0x3e0   :  { %4113 = vmatmul.mubr.msk.f32.vlgmr.msra.gmra.mxu1 %vm1623_vm2, %v1793_v20 }
 0x3e1   :  { %v4281_v31 = vpop.eup %4280  ;;  %4121 = vmatpush3.msra.mxu1 %v417_v54  ;;  %4122 = vmatprep.mubr.msk.f32.mxu1 %vm4389_vm0, %v4388_v0 }
 0x3e2   :  { %v1797_v62 = vmul.f32 %v4281_v31, %v4819_v8  ;;  %4130 = vmatprep.subr.mxu1 %v3059_v19 }
 0x3e4   :  { %4123 = vmatmul.mubr.msk.f32.vlgmr.msra.gmra.mxu1 %vm1623_vm2, %v1797_v62 }
 0x3e5   :  { %4131 = vmatpush3.msra.mxu1 %v3059_v19 }
 0x3e6   :  { %4132 = vmatprep.subr.mxu1 %v3058_v56 }
 0x3e7   :  { %4133 = vmatpush3.msra.mxu1 %v3058_v56 }
 0x3e8   :  { %4134 = vmatprep.subr.mxu1 %v3057_v7 }
 0x3e9   :  { %4135 = vmatpush3.msra.mxu1 %v3057_v7 }
 0x3ea   :  { %4136 = vmatprep.subr.mxu1 %v3056_v4 }
 0x3eb   :  { %4137 = vmatpush3.msra.mxu1 %v3056_v4 }
 0x3ec   :  { %4138 = vmatprep.subr.mxu1 %v3055_v39 }
 0x3ed   :  { %4139 = vmatpush3.msra.mxu1 %v3055_v39 }
 0x3ee   :  { %4140 = vmatprep.subr.mxu1 %v3054_v12 }
 0x3ef   :  { %4141 = vmatpush3.msra.mxu1 %v3054_v12 }
 0x3f0   :  { %4142 = vmatprep.subr.mxu1 %v3053_v16 }
 0x3f1   :  { %4143 = vmatpush3.msra.mxu1 %v3053_v16 }
 0x3f2   :  { %4144 = vmatprep.subr.mxu1 %v3052_v6 }
 0x3f3   :  { %4145 = vmatpush3.msra.mxu1 %v3052_v6 }
 0x3f4   :  { %4146 = vmatprep.subr.mxu1 %v3051_v41 }
 0x3f5   :  { %4147 = vmatpush3.msra.mxu1 %v3051_v41 }
 0x3f6   :  { %4148 = vmatprep.subr.mxu1 %v3050_v42 }
 0x3f7   :  { %4149 = vmatpush3.msra.mxu1 %v3050_v42  ;;  %v4290_v42 = vld [vmem:[%s4998_s0 + $0x8] sm:$0xff] }
 0x3f8   :  { %4150 = vmatprep.subr.mxu1 %v3049_v43 }
 0x3f9   :  { %4151 = vmatpush3.msra.mxu1 %v3049_v43  ;;  %v4291_v43 = vld [vmem:[%s4998_s0] sm:$0xff] }
 0x3fa   :  { %4152 = vmatprep.subr.mxu1 %v3048_v61 }
 0x3fb   :  { %4153 = vmatpush3.msra.mxu1 %v3048_v61 }
 0x3fc   :  { %4154 = vmatprep.subr.mxu1 %v3047_v35 }
 0x3fd   :  { %4155 = vmatpush3.msra.mxu1 %v3047_v35  ;;  %v3246_v35 = vld [vmem:[#allocation6 + $0x1e8] sm:$0xff] }
 0x3fe   :  { %4156 = vmatprep.subr.mxu1 %v3046_v63  ;;  %3271 = vmatprep.subr.mxu0 %v3246_v35  ;;  %v3199_v35 = vld [vmem:[#allocation6 + $0x70] sm:$0xff] }
 0x3ff   :  { %4157 = vmatpush3.msra.mxu1 %v3046_v63  ;;  %v3248_v63 = vld [vmem:[#allocation6 + $0x1f8] sm:$0xff] }
 0x400   :  { %4158 = vmatprep.subr.mxu1 %v3045_v11 }
 0x401   :  { %4159 = vmatpush3.msra.mxu1 %v3045_v11  ;;  %v3247_v11 = vld [vmem:[#allocation6 + $0x1f0] sm:$0xff] }
 0x402   :  { %4160 = vmatprep.subr.mxu1 %v3044_v17 }
 0x403   :  { %4161 = vmatpush3.msra.mxu1 %v3044_v17  ;;  %v3244_v17 = vld [vmem:[#allocation6 + $0x1d8] sm:$0xff] }
 0x404   :  { %3348 = vmatprep.subr.mxu1 %v3248_v63  ;;  %v3194_v63 = vld [vmem:[#allocation6 + $0x48] sm:$0xff] }
 0x418   :  { %v4914_v32 = vpop.f32.mrf.mxu0 }
 0x41a   :  { %v4059_v44 = vpop.f32.mrf.mxu0 }
 0x440   :  { %v4916_v33 = vpop.f32.mrf.mxu1 }
 0x442   :  { %v4054_v50 = vpop.f32.mrf.mxu1 }
 0x457   :  { %v2015_v2 = vpop.f32.mrf.mxu1 }
 0x459   :  { %v4064_v47 = vpop.f32.mrf.mxu1 }
 0x460   :  { %v2088_v36 = vpop.f32.mrf.mxu0 }
 0x461   :  { %v4183_v37 = vpack.i.bf16 %v2088_v36, %v2015_v2 }
 0x462   :  { %v4069_v45 = vpop.f32.mrf.mxu0 }
 0x463   :  { %4184 = vrot.lane.b32.xlu0 %v4183_v37, %s4395_s23 }
 0x467   :  { %v2161_v48 = vpop.f32.mrf.mxu1 }
 0x468   :  { %v2234_v13 = vpop.f32.mrf.mxu0 }
 0x469   :  { %v4188_v8 = vpack.i.bf16 %v2234_v13, %v2161_v48  ;;  %v4074_v60 = vpop.f32.mrf.mxu1 }
 0x46a   :  { %v4079_v59 = vpop.f32.mrf.mxu0 }
 0x46b   :  { %4189 = vrot.lane.b32.xlu1 %v4188_v8, %s4386_s25  ;;  %v2307_v57 = vpop.f32.mrf.mxu1 }
 0x46c   :  { %v2380_v58 = vpop.f32.mrf.mxu0 }
 0x46d   :  { %v4193_v23 = vpack.i.bf16 %v2380_v58, %v2307_v57  ;;  %v4084_v5 = vpop.f32.mrf.mxu1 }
 0x46e   :  { %v4089_v9 = vpop.f32.mrf.mxu0 }
 0x46f   :  { %4194 = vrot.lane.b32.xlu0 %v4193_v23, %s4394_s22  ;;  %v2453_v10 = vpop.f32.mrf.mxu1 }
 0x470   :  { %v2526_v28 = vpop.f32.mrf.mxu0 }
 0x471   :  { %v4198_v40 = vpack.i.bf16 %v2526_v28, %v2453_v10  ;;  %v4094_v29 = vpop.f32.mrf.mxu1 }
 0x472   :  { %v4099_v14 = vpop.f32.mrf.mxu0 }
 0x473   :  { %4199 = vrot.lane.b32.xlu1 %v4198_v40, %s4393_s21 }
 0x474   :  { %v2672_v18 = vpop.f32.mrf.mxu0 }
 0x476   :  { %v4109_v34 = vpop.f32.mrf.mxu0 }
 0x478   :  { %v2818_v21 = vpop.f32.mrf.mxu0 }
 0x47a   :  { %v4119_v1 = vpop.f32.mrf.mxu0 }
 0x499   :  { %v2964_v49 = vpop.f32.mrf.mxu0 }
 0x49b   :  { %v4129_v15 = vpop.f32.mrf.mxu0 }
 0x49c   :  { %v2599_v22 = vpop.f32.mrf.mxu1  ;;  %v3242_v15 = vld [vmem:[#allocation6 + $0x1c8] sm:$0xff] }
 0x49d   :  { %v4203_v24 = vpack.i.bf16 %v2672_v18, %v2599_v22  ;;  %v3753_v18 = vld [vmem:[%s5002_s4] ss:$0 sm:$0xff] }
 0x49e   :  { %v4104_v25 = vpop.f32.mrf.mxu1  ;;  %v3241_v22 = vld [vmem:[#allocation6 + $0x1c0] sm:$0xff] }
 0x49f   :  { %4204 = vrot.lane.b32.xlu0 %v4203_v24, %s4392_s2  ;;  %v3243_v24 = vld [vmem:[#allocation6 + $0x1d0] sm:$0xff]  ;;  %v3238_v25 = vld [vmem:[#allocation6 + $0x1a8] sm:$0xff] }
 0x4a0   :  { %v2745_v26 = vpop.f32.mrf.mxu1 }
 0x4a1   :  { %v4208_v46 = vpack.i.bf16 %v2818_v21, %v2745_v26  ;;  %v3240_v26 = vld [vmem:[#allocation6 + $0x1b8] sm:$0xff] }
 0x4a2   :  { %v4114_v27 = vpop.f32.mrf.mxu1 }
 0x4a3   :  { %4209 = vrot.lane.b32.xlu1 %v4208_v46, %s4390_s19  ;;  %v3237_v46 = vld [vmem:[#allocation6 + $0x1a0] sm:$0xff]  ;;  %v3239_v27 = vld [vmem:[#allocation6 + $0x1b0] sm:$0xff] }
 0x4a4   :  { %v2891_v38 = vpop.f32.mrf.mxu1 }
 0x4a5   :  { %v4213_v51 = vpack.i.bf16 %v2964_v49, %v2891_v38  ;;  %v3245_v49 = vld [vmem:[#allocation6 + $0x1e0] sm:$0xff] }
 0x4a6   :  { %v4124_v30 = vpop.f32.mrf.mxu1  ;;  %3272 = vmatpush1.msra.mxu0 %v3245_v49  ;;  %v3196_v49 = vld [vmem:[#allocation6 + $0x58] sm:$0xff] }
 0x4a7   :  { %4214 = vrot.lane.b32.xlu0 %v4213_v51, %s4391_s20  ;;  %3273 = vmatprep.subr.mxu0 %v3242_v15  ;;  %v3195_v15 = vld [vmem:[#allocation6 + $0x50] sm:$0xff] }
 0x4a8   :  { %3274 = vmatpush1.msra.mxu0 %v3241_v22  ;;  %v3192_v22 = vld [vmem:[#allocation6 + $0x38] sm:$0xff] }
 0x4a9   :  { %3275 = vmatprep.subr.mxu0 %v3238_v25  ;;  %v3191_v25 = vld [vmem:[#allocation6 + $0x30] sm:$0xff] }
 0x4aa   :  { %3276 = vmatpush1.msra.mxu0 %v3237_v46  ;;  %v3188_v46 = vld [vmem:[#allocation6 + $0x18] sm:$0xff] }
 0x4d5   :  { %v4185_v20 = vpop.permute.xlu0 %4184 }
 0x4d6   :  { %v4187_v44 = vunpack.i.h.bf16 %v4185_v20  ;;  %v4186_v50 = vunpack.i.l.bf16 %v4185_v20 }
 0x4d8   :  { %v3025_v56 = vsel %vm422_vm1, %v4914_v32, %v4187_v44  ;;  %v3024_v8 = vsel %vm422_vm1, %v4916_v33, %v4186_v50  ;;  %v3234_v50 = vld [vmem:[#allocation6 + $0x188] sm:$0xff] }
 0x4d9   :  { %3277 = vmatprep.subr.mxu0 %v3234_v50 }
 0x4dd   :  { %v4190_v54 = vpop.permute.xlu1 %4189 }
 0x4de   :  { %v4192_v2 = vunpack.i.h.bf16 %v4190_v54  ;;  %v4191_v47 = vunpack.i.l.bf16 %v4190_v54 }
 0x4e0   :  { %v3028_v7 = vsel %vm3026_vm3, %v3025_v56, %v4192_v2  ;;  %v3027_v57 = vsel %vm3026_vm3, %v3024_v8, %v4191_v47  ;;  %v3236_v2 = vld [vmem:[#allocation6 + $0x198] sm:$0xff]  ;;  %v3233_v47 = vld [vmem:[#allocation6 + $0x180] sm:$0xff] }
 0x4e1   :  { %v4195_v31 = vpop.permute.xlu0 %4194  ;;  %3278 = vmatpush1.msra.mxu0 %v3233_v47  ;;  %v3228_v56 = vld [vmem:[#allocation6 + $0x158] sm:$0xff]  ;;  %v3225_v8 = vld [vmem:[#allocation6 + $0x140] sm:$0xff] }
 0x4e2   :  { %v4197_v37 = vunpack.i.h.bf16 %v4195_v31  ;;  %v4196_v45 = vunpack.i.l.bf16 %v4195_v31 }
 0x4e4   :  { %v3031_v23 = vsel %vm3029_vm4, %v3028_v7, %v4197_v37  ;;  %v3030_v5 = vsel %vm3029_vm4, %v3027_v57, %v4196_v45  ;;  %v3230_v37 = vld [vmem:[#allocation6 + $0x168] sm:$0xff]  ;;  %v3232_v45 = vld [vmem:[#allocation6 + $0x178] sm:$0xff]  ;;  %v3221_v57 = vld [vmem:[#allocation6 + $0x120] sm:$0xff] }
 0x4e5   :  { %v4200_v62 = vpop.permute.xlu1 %4199  ;;  %3279 = vmatprep.subr.mxu0 %v3230_v37  ;;  %v3224_v7 = vld [vmem:[#allocation6 + $0x138] sm:$0xff] }
 0x4e6   :  { %v4202_v48 = vunpack.i.h.bf16 %v4200_v62  ;;  %v4201_v13 = vunpack.i.l.bf16 %v4200_v62 }
 0x4e8   :  { %v3034_v9 = vsel %vm3032_vm5, %v3031_v23, %v4202_v48  ;;  %v3033_v39 = vsel %vm3032_vm5, %v3030_v5, %v4201_v13  ;;  %v3229_v48 = vld [vmem:[#allocation6 + $0x160] sm:$0xff]  ;;  %v3231_v13 = vld [vmem:[#allocation6 + $0x170] sm:$0xff]  ;;  %v3220_v23 = vld [vmem:[#allocation6 + $0x118] sm:$0xff] }
 0x4e9   :  { %3280 = vmatpush1.msra.mxu0 %v3229_v48  ;;  %v3217_v5 = vld [vmem:[#allocation6 + $0x100] sm:$0xff] }
 0x511   :  { %v4205_v36 = vpop.permute.xlu0 %4204 }
 0x512   :  { %v4207_v60 = vunpack.i.h.bf16 %v4205_v36  ;;  %v4206_v59 = vunpack.i.l.bf16 %v4205_v36  ;;  %v3235_v36 = vld [vmem:[#allocation6 + $0x190] sm:$0xff] }
 0x514   :  { %v3037_v32 = vsel %vm3035_vm6, %v3034_v9, %v4207_v60  ;;  %v3036_v12 = vsel %vm3035_vm6, %v3033_v39, %v4206_v59  ;;  %v3227_v60 = vld [vmem:[#allocation6 + $0x150] sm:$0xff]  ;;  %v3222_v59 = vld [vmem:[#allocation6 + $0x128] sm:$0xff] }
 0x515   :  { %v4210_v19 = vpop.permute.xlu1 %4209  ;;  %v3219_v9 = vld [vmem:[#allocation6 + $0x110] sm:$0xff]  ;;  %v3214_v39 = vld [vmem:[#allocation6 + $0xe8] sm:$0xff] }
 0x516   :  { %v4212_v58 = vunpack.i.h.bf16 %v4210_v19  ;;  %v4211_v4 = vunpack.i.l.bf16 %v4210_v19  ;;  %v3226_v19 = vld [vmem:[#allocation6 + $0x148] sm:$0xff] }
 0x517   :  { %3281 = vmatprep.subr.mxu0 %v3226_v19 }
 0x518   :  { %v3039_v40 = vsel %vm3038_vm7, %v3036_v12, %v4211_v4  ;;  %v3040_v29 = vsel %vm3038_vm7, %v3037_v32, %v4212_v58  ;;  %3282 = vmatpush1.msra.mxu0 %v3225_v8  ;;  %v3223_v58 = vld [vmem:[#allocation6 + $0x130] sm:$0xff]  ;;  %v3218_v4 = vld [vmem:[#allocation6 + $0x108] sm:$0xff]  ;;  %v3213_v32 = vld [vmem:[#allocation6 + $0xe0] sm:$0xff] }
 0x519   :  { %v4215_v10 = vpop.permute.xlu0 %4214  ;;  %3283 = vmatprep.subr.mxu0 %v3222_v59  ;;  %v3212_v12 = vld [vmem:[#allocation6 + $0xd8] sm:$0xff] }
 0x51a   :  { %v4217_v33 = vunpack.i.h.bf16 %v4215_v10  ;;  %v4216_v28 = vunpack.i.l.bf16 %v4215_v10  ;;  %3284 = vmatpush1.msra.mxu0 %v3221_v57  ;;  %v3216_v10 = vld [vmem:[#allocation6 + $0xf8] sm:$0xff] }
 0x51b   :  { %3285 = vmatprep.subr.mxu0 %v3218_v4  ;;  %v3448_v59 = vld [vmem:[#allocation7 + $0x78] sm:$0xff]  ;;  %v3479_v4 = vld [vmem:[#allocation7 + $0x170] sm:$0xff] }
 0x51c   :  { %v3042_v14 = vsel %vm3041_vm8, %v3039_v40, %v4216_v28  ;;  %v3043_v16 = vsel %vm3041_vm8, %v3040_v29, %v4217_v33  ;;  %v3215_v33 = vld [vmem:[#allocation6 + $0xf0] sm:$0xff]  ;;  %3286 = vmatpush1.msra.mxu0 %v3217_v5  ;;  %v3210_v28 = vld [vmem:[#allocation6 + $0xc8] sm:$0xff]  ;;  %v3209_v40 = vld [vmem:[#allocation6 + $0xc0] sm:$0xff] }
 0x51d   :  { %4162 = vmatprep.mubr.f32.mxu1 %v3042_v14  ;;  %3287 = vmatprep.subr.mxu0 %v3214_v39  ;;  %v3211_v29 = vld [vmem:[#allocation6 + $0xd0] sm:$0xff]  ;;  %v3206_v14 = vld [vmem:[#allocation6 + $0xa8] sm:$0xff] }
 0x51e   :  { %4163 = vmatmul.mubr.f32.vlgmr.msra.gmra.mxu1 %v3043_v16  ;;  %3288 = vmatpush1.msra.mxu0 %v3213_v32  ;;  %v3208_v16 = vld [vmem:[#allocation6 + $0xb8] sm:$0xff]  ;;  %v3494_v5 = vld [vmem:[#allocation7 + $0x1e8] sm:$0xff]  ;;  %v3445_v32 = vld [vmem:[#allocation7 + $0x60] sm:$0xff] }
 0x51f   :  { %3412 = vmatprep.mubr.f32.mxu1 %v4388_v0  ;;  %3349 = vmatpush1.msra.mxu1 %v3247_v11  ;;  %v3193_v11 = vld [vmem:[#allocation6 + $0x40] sm:$0xff]  ;;  %v3478_v39 = vld [vmem:[#allocation7 + $0x168] sm:$0xff] }
 0x520   :  { %3350 = vmatprep.subr.mxu1 %v3244_v17  ;;  %3289 = vmatprep.subr.mxu0 %v3210_v28  ;;  %v3190_v17 = vld [vmem:[#allocation6 + $0x28] sm:$0xff]  ;;  %v3460_v28 = vld [vmem:[#allocation7 + $0xd8] sm:$0xff] }
 0x521   :  { %3351 = vmatpush1.msra.mxu1 %v3243_v24  ;;  %3290 = vmatpush1.msra.mxu0 %v3209_v40  ;;  %v3189_v24 = vld [vmem:[#allocation6 + $0x20] sm:$0xff]  ;;  %v3444_v40 = vld [vmem:[#allocation7 + $0x58] sm:$0xff] }
 0x522   :  { %3352 = vmatprep.subr.mxu1 %v3240_v26  ;;  %3291 = vmatprep.subr.mxu0 %v3206_v14  ;;  %v3186_v26 = vld [vmem:[#allocation6 + $0x8] sm:$0xff]  ;;  %v3459_v14 = vld [vmem:[#allocation7 + $0xd0] sm:$0xff] }
 0x523   :  { %3353 = vmatpush1.msra.mxu1 %v3239_v27  ;;  %v3185_v27 = vld [vmem:[#allocation6] sm:$0xff] }
 0x524   :  { %3354 = vmatprep.subr.mxu1 %v3236_v2 }
 0x525   :  { %3355 = vmatpush1.msra.mxu1 %v3235_v36 }
 0x526   :  { %3356 = vmatprep.subr.mxu1 %v3232_v45 }
 0x527   :  { %3357 = vmatpush1.msra.mxu1 %v3231_v13  ;;  %v3754_v13 = vld [vmem:[%s5003_s5] ss:$0 sm:$0xff] }
 0x528   :  { %3358 = vmatprep.subr.mxu1 %v3228_v56  ;;  %v3755_v56 = vld [vmem:[%s5004_s6] ss:$0 sm:$0xff] }
 0x529   :  { %3359 = vmatpush1.msra.mxu1 %v3227_v60 }
 0x52a   :  { %3360 = vmatprep.subr.mxu1 %v3224_v7  ;;  %v3480_v7 = vld [vmem:[#allocation7 + $0x178] sm:$0xff] }
 0x52b   :  { %3361 = vmatpush1.msra.mxu1 %v3223_v58  ;;  %v3447_v58 = vld [vmem:[#allocation7 + $0x70] sm:$0xff] }
 0x52c   :  { %3362 = vmatprep.subr.mxu1 %v3220_v23  ;;  %v3462_v23 = vld [vmem:[#allocation7 + $0xe8] sm:$0xff] }
 0x52d   :  { %3363 = vmatpush1.msra.mxu1 %v3219_v9  ;;  %v3446_v9 = vld [vmem:[#allocation7 + $0x68] sm:$0xff] }
 0x52e   :  { %3364 = vmatprep.subr.mxu1 %v3216_v10  ;;  %v3461_v10 = vld [vmem:[#allocation7 + $0xe0] sm:$0xff] }
 0x52f   :  { %3365 = vmatpush1.msra.mxu1 %v3215_v33  ;;  %v3477_v33 = vld [vmem:[#allocation7 + $0x160] sm:$0xff] }
 0x530   :  { %3366 = vmatprep.subr.mxu1 %v3212_v12  ;;  %v3492_v12 = vld [vmem:[#allocation7 + $0x1d8] sm:$0xff] }
 0x531   :  { %3367 = vmatpush1.msra.mxu1 %v3211_v29  ;;  %v3476_v29 = vld [vmem:[#allocation7 + $0x158] sm:$0xff] }
 0x532   :  { %3368 = vmatprep.subr.mxu1 %v3208_v16  ;;  %v3491_v16 = vld [vmem:[#allocation7 + $0x1d0] sm:$0xff] }
 0x5de   :  { %v4164_v6 = vpop.f32.mrf.mxu1 }
 0x5df   :  { %v3139_v34 = vadd.f32 %v4164_v6, %v3753_v18  ;;  %v3207_v6 = vld [vmem:[#allocation6 + $0xb0] sm:$0xff] }
 0x5e0   :  { %v3133_v41 = vpop.f32.mrf.mxu1  ;;  %3369 = vmatpush1.msra.mxu1 %v3207_v6  ;;  %v3475_v6 = vld [vmem:[#allocation7 + $0x150] sm:$0xff] }
 0x5e1   :  { %v3134_v21 = vadd.f32 %v3753_v18, %v3133_v41  ;;  %v3143_v1 = vadd.f32 %v4290_v42, %v3139_v34  ;;  %v3205_v18 = vld [vmem:[#allocation6 + $0xa0] sm:$0xff]  ;;  %v3202_v34 = vld [vmem:[#allocation6 + $0x88] sm:$0xff]  ;;  %v3204_v41 = vld [vmem:[#allocation6 + $0x98] sm:$0xff] }
 0x5e2   :  { %v3203_v42 = vld [vmem:[#allocation6 + $0x90] sm:$0xff]  ;;  %3292 = vmatpush1.msra.mxu0 %v3205_v18  ;;  %3370 = vmatprep.subr.mxu1 %v3204_v41  ;;  %v3490_v41 = vld [vmem:[#allocation7 + $0x1c8] sm:$0xff] }
 0x5e3   :  { %3146 = vadd.xlane.f32.xlu0 %v3143_v1  ;;  %v3142_v61 = vadd.f32 %v4291_v43, %v3134_v21  ;;  %v3201_v21 = vld [vmem:[#allocation6 + $0x80] sm:$0xff]  ;;  %v3200_v43 = vld [vmem:[#allocation6 + $0x78] sm:$0xff]  ;;  %3293 = vmatprep.subr.mxu0 %v3202_v34  ;;  %v3443_v18 = vld [vmem:[#allocation7 + $0x50] sm:$0xff] }
 0x5e4   :  { %3294 = vmatpush1.msra.mxu0 %v3201_v21  ;;  %3371 = vmatpush1.msra.mxu1 %v3203_v42  ;;  %v3458_v34 = vld [vmem:[#allocation7 + $0xc8] sm:$0xff] }
 0x5e5   :  { %3144 = vadd.xlane.f32.xlu1 %v3142_v61  ;;  %3372 = vmatprep.subr.mxu1 %v3200_v43  ;;  %v3442_v21 = vld [vmem:[#allocation7 + $0x48] sm:$0xff]  ;;  %v3489_v43 = vld [vmem:[#allocation7 + $0x1c0] sm:$0xff] }
 0x5e6   :  { %3373 = vmatpush1.msra.mxu1 %v3199_v35  ;;  %v3474_v42 = vld [vmem:[#allocation7 + $0x148] sm:$0xff]  ;;  %v3473_v35 = vld [vmem:[#allocation7 + $0x140] sm:$0xff] }
 0x5e7   :  { %3374 = vmatprep.subr.mxu1 %v3196_v49  ;;  %v3488_v49 = vld [vmem:[#allocation7 + $0x1b8] sm:$0xff] }
 0x5e8   :  { %3375 = vmatpush1.msra.mxu1 %v3195_v15  ;;  %v3472_v15 = vld [vmem:[#allocation7 + $0x138] sm:$0xff] }
 0x5e9   :  { %3376 = vmatprep.subr.mxu1 %v3192_v22  ;;  %v3487_v22 = vld [vmem:[#allocation7 + $0x1b0] sm:$0xff] }
 0x5ea   :  { %3377 = vmatpush1.msra.mxu1 %v3191_v25  ;;  %v3471_v25 = vld [vmem:[#allocation7 + $0x130] sm:$0xff] }
 0x5eb   :  { %3378 = vmatprep.subr.mxu1 %v3188_v46  ;;  %v3486_v46 = vld [vmem:[#allocation7 + $0x1a8] sm:$0xff] }
 0x66c   :  { %v3147_v38 = vpop.xlane.xlu0 %3146 }
 0x66d   :  { %v3150_v51 = vmul.f32 0.0078125, %v3147_v38  ;;  %v3187_v38 = vld [vmem:[#allocation6 + $0x10] sm:$0xff] }
 0x66e   :  { %v3145_v30 = vpop.xlane.xlu1 %3144  ;;  %3379 = vmatpush1.msra.mxu1 %v3187_v38  ;;  %v3470_v38 = vld [vmem:[#allocation7 + $0x128] sm:$0xff] }
 0x66f   :  { %v4945_v20 = vsub.f32 %v3143_v1, %v3150_v51  ;;  %v3149_v54 = vmul.f32 0.0078125, %v3145_v30  ;;  %v3198_v1 = vld [vmem:[#allocation6 + $0x68] sm:$0xff]  ;;  %v3464_v51 = vld [vmem:[#allocation7 + $0xf8] sm:$0xff] }
 0x670   :  { %3295 = vmatprep.subr.mxu0 %v3198_v1  ;;  %v3496_v30 = vld [vmem:[#allocation7 + $0x1f8] sm:$0xff]  ;;  %v3457_v1 = vld [vmem:[#allocation7 + $0xc0] sm:$0xff] }
 0x671   :  { %v4947_v31 = vsub.f32 %v3142_v61, %v3149_v54  ;;  %v3154_v62 = vmul.f32 %v4945_v20, %v4945_v20  ;;  %v3197_v61 = vld [vmem:[#allocation6 + $0x60] sm:$0xff]  ;;  %3897 = vmatprep.subr.mxu1 %v3496_v30 }
 0x672   :  { %3296 = vmatpush1.msra.mxu0 %v3197_v61  ;;  %v3441_v61 = vld [vmem:[#allocation7 + $0x40] sm:$0xff] }
 0x673   :  { %3157 = vadd.xlane.f32.xlu1 %v3154_v62  ;;  %v3153_v44 = vmul.f32 %v4947_v31, %v4947_v31  ;;  %3297 = vmatprep.subr.mxu0 %v3194_v63  ;;  %v3456_v63 = vld [vmem:[#allocation7 + $0xb8] sm:$0xff]  ;;  %v3485_v30 = vld [vmem:[#allocation7 + $0x1a0] sm:$0xff] }
 0x674   :  { %3298 = vmatpush1.msra.mxu0 %v3193_v11  ;;  %v3440_v11 = vld [vmem:[#allocation7 + $0x38] sm:$0xff] }
 0x675   :  { %3155 = vadd.xlane.f32.xlu0 %v3153_v44  ;;  %3299 = vmatprep.subr.mxu0 %v3190_v17  ;;  %v3455_v17 = vld [vmem:[#allocation7 + $0xb0] sm:$0xff] }
 0x676   :  { %3300 = vmatpush1.msra.mxu0 %v3189_v24  ;;  %v3439_v24 = vld [vmem:[#allocation7 + $0x30] sm:$0xff] }
 0x677   :  { %3301 = vmatprep.subr.mxu0 %v3186_v26  ;;  %v3454_v26 = vld [vmem:[#allocation7 + $0xa8] sm:$0xff] }
 0x678   :  { %3302 = vmatpush1.msra.mxu0 %v3185_v27  ;;  %v3438_v27 = vld [vmem:[#allocation7 + $0x28] sm:$0xff] }
 0x679   :  { %3859 = vmatprep.subr.mxu0 %v3464_v51  ;;  %v3453_v51 = vld [vmem:[#allocation7 + $0xa0] sm:$0xff] }
 0x6fc   :  { %v3158_v54 = vpop.xlane.xlu1 %3157 }
 0x6fd   :  { %v3160_v62 = vmul.f32 0.0078125, %v3158_v54  ;;  %v3437_v54 = vld [vmem:[#allocation7 + $0x20] sm:$0xff] }
 0x6fe   :  { %v3156_v44 = vpop.xlane.xlu0 %3155 }
 0x6ff   :  { %v3162_v50 = vadd.f32 1e-05, %v3160_v62  ;;  %v3159_v2 = vmul.f32 0.0078125, %v3156_v44  ;;  %v3469_v62 = vld [vmem:[#allocation7 + $0x120] sm:$0xff]  ;;  %v3452_v44 = vld [vmem:[#allocation7 + $0x98] sm:$0xff] }
 0x701   :  { %4282 = vrsqrt.f32 %v3162_v50  ;;  %v3161_v47 = vadd.f32 1e-05, %v3159_v2  ;;  %v3484_v50 = vld [vmem:[#allocation7 + $0x198] sm:$0xff] }
 0x702   :  { %v3436_v2 = vld [vmem:[#allocation7 + $0x18] sm:$0xff] }
 0x703   :  { %4284 = vrsqrt.f32 %v3161_v47  ;;  %v3468_v47 = vld [vmem:[#allocation7 + $0x118] sm:$0xff] }
 0x70e   :  { %v4283_v36 = vpop.eup %4282 }
 0x70f   :  { %v3166_v48 = vmul.f32 %v4283_v36, %v4945_v20  ;;  %v3495_v20 = vld [vmem:[#allocation7 + $0x1f0] sm:$0xff] }
 0x710   :  { %v4285_v37 = vpop.eup %4284  ;;  %v3451_v36 = vld [vmem:[#allocation7 + $0x90] sm:$0xff] }
 0x711   :  { %v3165_v45 = vmul.f32 %v4285_v37, %v4947_v31  ;;  %v3175_v60 = vmul.f32 %v3754_v13, %v3166_v48  ;;  %v3463_v31 = vld [vmem:[#allocation7 + $0xf0] sm:$0xff] }
 0x712   :  { %v3483_v37 = vld [vmem:[#allocation7 + $0x190] sm:$0xff] }
 0x713   :  { %v3174_v19 = vmul.f32 %v3754_v13, %v3165_v45  ;;  %v4967_v57 = vadd.f32 %v3755_v56, %v3175_v60  ;;  %v3435_v45 = vld [vmem:[#allocation7 + $0x10] sm:$0xff]  ;;  %v3450_v13 = vld [vmem:[#allocation7 + $0x88] sm:$0xff] }
 0x714   :  { %v3467_v48 = vld [vmem:[#allocation7 + $0x110] sm:$0xff]  ;;  %v3466_v60 = vld [vmem:[#allocation7 + $0x108] sm:$0xff] }
 0x715   :  { %v4961_v8 = vadd.f32 %v3755_v56, %v3174_v19  ;;  %v3482_v19 = vld [vmem:[#allocation7 + $0x188] sm:$0xff] }
 0x716   :  { %v3434_v56 = vld [vmem:[#allocation7 + $0x8] sm:$0xff] }
 0x717   :  { %3336 = vmatmul.mubr.f32.vlgmr.msra.gmra.mxu0 %v4961_v8  ;;  %3413 = vmatmul.mubr.f32.vlgmr.msra.gmra.mxu1 %v4961_v8 }
 0x718   :  { %3341 = vmatprep.mubr.f32.mxu0 %v4388_v0  ;;  %3418 = vmatprep.mubr.f32.mxu1 %v4388_v0  ;;  %v3493_v0 = vld [vmem:[#allocation7 + $0x1e0] sm:$0xff] }
 0x719   :  { %3860 = vmatpush3.msra.mxu0 %v3448_v59  ;;  %3898 = vmatpush3.msra.mxu1 %v3480_v7  ;;  %v3449_v59 = vld [vmem:[#allocation7 + $0x80] sm:$0xff] }
 0x71a   :  { %3861 = vmatprep.subr.mxu0 %v3463_v31  ;;  %3899 = vmatprep.subr.mxu1 %v3495_v20  ;;  %v3481_v7 = vld [vmem:[#allocation7 + $0x180] sm:$0xff] }
 0x71b   :  { %3342 = vmatmul.mubr.f32.gmra.mxu0 %v4967_v57  ;;  %3419 = vmatmul.mubr.f32.gmra.mxu1 %v4967_v57  ;;  %v3433_v31 = vld [vmem:[#allocation7] sm:$0xff] }
 0x71c   :  { %3862 = vmatpush3.msra.mxu0 %v3447_v58  ;;  %3900 = vmatpush3.msra.mxu1 %v3479_v4  ;;  %v3465_v20 = vld [vmem:[#allocation7 + $0x100] sm:$0xff]  ;;  %v3265_v4 = vsub.s32 3, %v4503_v52 }
 0x71d   :  { %3863 = vmatprep.subr.mxu0 %v3462_v23  ;;  %3901 = vmatprep.subr.mxu1 %v3494_v5  ;;  %v3249_v58 = vld [vmem:[%s5006_s8] sm:$0xf] }
 0x71e   :  { %3864 = vmatpush3.msra.mxu0 %v3446_v9  ;;  %3902 = vmatpush3.msra.mxu1 %v3478_v39  ;;  %v3254_v23 = vrot.slane %v3249_v58, %v153_v53  ;;  %v3262_v5 = vrot.slane %v3249_v58, %v161_v3  ;;  %v3258_v9 = vrot.slane %v3249_v58, %v157_v55 }
 0x71f   :  { %3865 = vmatprep.subr.mxu0 %v3461_v10  ;;  %3903 = vmatprep.subr.mxu1 %v3493_v0  ;;  %v3266_v39 = vrot.slane %v3249_v58, %v3265_v4  ;;  %v3757_v58 = vld [vmem:[%s5009_s11] ss:$0 sm:$0xff] }
 0x720   :  { %3866 = vmatpush3.msra.mxu0 %v3445_v32  ;;  %3904 = vmatpush3.msra.mxu1 %v3477_v33 }
 0x721   :  { %3867 = vmatprep.subr.mxu0 %v3460_v28  ;;  %3905 = vmatprep.subr.mxu1 %v3492_v12 }
 0x722   :  { %3868 = vmatpush3.msra.mxu0 %v3444_v40  ;;  %3906 = vmatpush3.msra.mxu1 %v3476_v29 }
 0x723   :  { %3869 = vmatprep.subr.mxu0 %v3459_v14  ;;  %3907 = vmatprep.subr.mxu1 %v3491_v16 }
 0x724   :  { %3870 = vmatpush3.msra.mxu0 %v3443_v18  ;;  %3908 = vmatpush3.msra.mxu1 %v3475_v6 }
 0x725   :  { %3871 = vmatprep.subr.mxu0 %v3458_v34  ;;  %3909 = vmatprep.subr.mxu1 %v3490_v41 }
 0x726   :  { %3872 = vmatpush3.msra.mxu0 %v3442_v21  ;;  %3910 = vmatpush3.msra.mxu1 %v3474_v42 }
 0x727   :  { %3873 = vmatprep.subr.mxu0 %v3457_v1  ;;  %3911 = vmatprep.subr.mxu1 %v3489_v43 }
 0x728   :  { %3874 = vmatpush3.msra.mxu0 %v3441_v61  ;;  %3912 = vmatpush3.msra.mxu1 %v3473_v35 }
 0x729   :  { %3875 = vmatprep.subr.mxu0 %v3456_v63  ;;  %3913 = vmatprep.subr.mxu1 %v3488_v49 }
 0x72a   :  { %3876 = vmatpush3.msra.mxu0 %v3440_v11  ;;  %3914 = vmatpush3.msra.mxu1 %v3472_v15  ;;  %v3756_v11 = vld [vmem:[%s5008_s10] ss:$0 sm:$0xff] }
 0x72b   :  { %3877 = vmatprep.subr.mxu0 %v3455_v17  ;;  %3915 = vmatprep.subr.mxu1 %v3487_v22 }
 0x72c   :  { %3878 = vmatpush3.msra.mxu0 %v3439_v24  ;;  %3916 = vmatpush3.msra.mxu1 %v3471_v25 }
 0x72d   :  { %3879 = vmatprep.subr.mxu0 %v3454_v26  ;;  %3917 = vmatprep.subr.mxu1 %v3486_v46 }
 0x72e   :  { %3880 = vmatpush3.msra.mxu0 %v3438_v27  ;;  %3918 = vmatpush3.msra.mxu1 %v3470_v38 }
 0x72f   :  { %3881 = vmatprep.subr.mxu0 %v3453_v51  ;;  %3919 = vmatprep.subr.mxu1 %v3485_v30 }
 0x730   :  { %3882 = vmatpush3.msra.mxu0 %v3437_v54  ;;  %3920 = vmatpush3.msra.mxu1 %v3469_v62 }
 0x731   :  { %3883 = vmatprep.subr.mxu0 %v3452_v44  ;;  %3921 = vmatprep.subr.mxu1 %v3484_v50 }
 0x732   :  { %3884 = vmatpush3.msra.mxu0 %v3436_v2  ;;  %3922 = vmatpush3.msra.mxu1 %v3468_v47 }
 0x733   :  { %3885 = vmatprep.subr.mxu0 %v3451_v36  ;;  %3923 = vmatprep.subr.mxu1 %v3483_v37 }
 0x734   :  { %3886 = vmatpush3.msra.mxu0 %v3435_v45  ;;  %3924 = vmatpush3.msra.mxu1 %v3467_v48 }
 0x735   :  { %3887 = vmatprep.subr.mxu0 %v3450_v13  ;;  %3925 = vmatprep.subr.mxu1 %v3482_v19 }
 0x736   :  { %3888 = vmatpush3.msra.mxu0 %v3434_v56  ;;  %3926 = vmatpush3.msra.mxu1 %v3466_v60 }
 0x737   :  { %3889 = vmatprep.subr.mxu0 %v3449_v59  ;;  %3927 = vmatprep.subr.mxu1 %v3481_v7 }
 0x738   :  { %3890 = vmatpush3.msra.mxu0 %v3433_v31  ;;  %3928 = vmatpush3.msra.mxu1 %v3465_v20 }
 0x7d7   :  { %v3337_v10 = vpop.f32.mrf.mxu0  ;;  %v3414_v0 = vpop.f32.mrf.mxu1 }
 0x7d8   :  { %v3338_v32 = vadd.f32 %v3337_v10, %v3254_v23  ;;  %v3415_v33 = vadd.f32 %v3414_v0, %v3262_v5 }
 0x7d9   :  { %v3339_v28 = vpop.f32.mrf.mxu0  ;;  %v3416_v12 = vpop.f32.mrf.mxu1 }
 0x7da   :  { %v3340_v40 = vadd.f32 %v3339_v28, %v3258_v9  ;;  %v3417_v29 = vadd.f32 %v3416_v12, %v3266_v39  ;;  %v3425_v53 = vmax.f32 %v3338_v32, 0.0  ;;  %v3427_v34 = vmax.f32 %v3415_v33, 0.0 }
 0x7db   :  { %v3343_v14 = vpop.f32.mrf.mxu0  ;;  %v3420_v16 = vpop.f32.mrf.mxu1 }
 0x7dc   :  { %v3426_v18 = vmax.f32 %v3340_v40, 0.0  ;;  %v3428_v6 = vmax.f32 %v3417_v29, 0.0  ;;  %v3344_v41 = vadd.f32 %v3343_v14, %v3254_v23  ;;  %v3421_v3 = vadd.f32 %v3420_v16, %v3262_v5  ;;  %v3758_v23 = vld [vmem:[%s5010_s12] ss:$0 sm:$0xff] }
 0x7dd   :  { %v3345_v21 = vpop.f32.mrf.mxu0  ;;  %v3422_v52 = vpop.f32.mrf.mxu1 }
 0x7de   :  { %v3346_v55 = vadd.f32 %v3345_v21, %v3258_v9  ;;  %v3423_v42 = vadd.f32 %v3422_v52, %v3266_v39  ;;  %3568 = vmatprep.mubr.f32.mxu0 %v3426_v18  ;;  %3643 = vmatprep.mubr.f32.mxu1 %v3428_v6  ;;  %v3429_v61 = vmax.f32 %v3344_v41, 0.0  ;;  %v3431_v35 = vmax.f32 %v3421_v3, 0.0 }
 0x7df   :  { %3569 = vmatmul.mubr.f32.vlgmr.msra.gmra.mxu0 %v3425_v53  ;;  %3644 = vmatmul.mubr.f32.vlgmr.msra.gmra.mxu1 %v3427_v34 }
 0x7e0   :  { %v3430_v1 = vmax.f32 %v3346_v55, 0.0  ;;  %v3432_v43 = vmax.f32 %v3423_v42, 0.0 }
 0x7e2   :  { %3573 = vmatprep.mubr.f32.mxu0 %v3430_v1  ;;  %3648 = vmatprep.mubr.f32.mxu1 %v3432_v43 }
 0x7e3   :  { %3574 = vmatmul.mubr.f32.gmra.mxu0 %v3429_v61  ;;  %3649 = vmatmul.mubr.f32.gmra.mxu1 %v3431_v35 }
 0x89f   :  { %v3891_v63 = vpop.f32.mrf.mxu0  ;;  %v3929_v49 = vpop.f32.mrf.mxu1 }
 0x8a1   :  { %v3892_v15 = vpop.f32.mrf.mxu0  ;;  %v3930_v17 = vpop.f32.mrf.mxu1 }
 0x8a2   :  { %v3893_v22 = vadd.f32 %v3892_v15, %v3891_v63  ;;  %v3931_v46 = vadd.f32 %v3930_v17, %v3929_v49 }
 0x8a3   :  { %v3894_v24 = vpop.f32.mrf.mxu0  ;;  %v3932_v25 = vpop.f32.mrf.mxu1 }
 0x8a4   :  { %v3571_v26 = vadd.f32 %v3893_v22, %v3756_v11 }
 0x8a5   :  { %v3895_v27 = vpop.f32.mrf.mxu0  ;;  %v3933_v38 = vpop.f32.mrf.mxu1 }
 0x8a6   :  { %v3646_v51 = vadd.f32 %v3931_v46, %v3571_v26  ;;  %v3896_v30 = vadd.f32 %v3895_v27, %v3894_v24  ;;  %v3934_v62 = vadd.f32 %v3933_v38, %v3932_v25 }
 0x8a8   :  { %v3576_v54 = vadd.f32 %v3896_v30, %v3756_v11  ;;  %v3654_v44 = vadd.f32 %v3646_v51, %v4961_v8 }
 0x8aa   :  { %v3651_v50 = vadd.f32 %v3934_v62, %v3576_v54  ;;  %3656 = vadd.xlane.f32.xlu0 %v3654_v44 }
 0x8ac   :  { %v3655_v2 = vadd.f32 %v3651_v50, %v4967_v57 }
 0x8ae   :  { %3658 = vadd.xlane.f32.xlu1 %v3655_v2 }
 0x933   :  { %v3657_v47 = vpop.xlane.xlu0 %3656 }
 0x934   :  { %v3660_v36 = vmul.f32 0.0078125, %v3657_v47 }
 0x936   :  { %v3662_v37 = vsub.f32 %v3654_v44, %v3660_v36 }
 0x937   :  { %v3659_v45 = vpop.xlane.xlu1 %3658 }
 0x938   :  { %v3661_v48 = vmul.f32 0.0078125, %v3659_v45  ;;  %v3664_v13 = vmul.f32 %v3662_v37, %v3662_v37 }
 0x93a   :  { %v3663_v19 = vsub.f32 %v3655_v2, %v3661_v48  ;;  %3666 = vadd.xlane.f32.xlu0 %v3664_v13 }
 0x93c   :  { %v3665_v56 = vmul.f32 %v3663_v19, %v3663_v19 }
 0x93e   :  { %3668 = vadd.xlane.f32.xlu1 %v3665_v56 }
 0x9c3   :  { %v3667_v60 = vpop.xlane.xlu0 %3666 }
 0x9c4   :  { %v3670_v59 = vmul.f32 0.0078125, %v3667_v60 }
 0x9c6   :  { %v3672_v7 = vadd.f32 1e-05, %v3670_v59 }
 0x9c7   :  { %v3669_v31 = vpop.xlane.xlu1 %3668 }
 0x9c8   :  { %4286 = vrsqrt.f32 %v3672_v7  ;;  %v3671_v8 = vmul.f32 0.0078125, %v3669_v31 }
 0x9ca   :  { %v3673_v20 = vadd.f32 1e-05, %v3671_v8 }
 0x9cc   :  { %4288 = vrsqrt.f32 %v3673_v20 }
 0x9d5   :  { %v4287_v57 = vpop.eup %4286 }
 0x9d6   :  { %v3676_v4 = vmul.f32 %v4287_v57, %v3662_v37 }
 0x9d8   :  { %v3685_v5 = vmul.f32 %v3757_v58, %v3676_v4 }
 0x9d9   :  { %v4289_v9 = vpop.eup %4288 }
 0x9da   :  { %v3694_v39 = vadd.f32 %v3758_v23, %v3685_v5  ;;  %v3677_v10 = vmul.f32 %v4289_v9, %v3663_v19 }
 0x9dc   :  { %3696 = vst [vmem:[%s5011_s13] sm:$0xff] %v3694_v39  ;;  %v3686_v0 = vmul.f32 %v3757_v58, %v3677_v10 }
 0x9de   :  { %v3695_v32 = vadd.f32 %v3758_v23, %v3686_v0 }
 0x9e0   :  { %3697 = vst [vmem:[%s5011_s13 + $0x8] sm:$0xff] %v3695_v32 }
 0x9e1   :  { %3702 = vsyncpa [#allocation3], 1 }
 0x9e2   :  { %3703 = vsyncpa [#allocation5], 1 }
 0x9e3   :  { %3704 = vsyncpa [#allocation8], 1 }

</bundles_post_ra>
